<compile_context>
chip_gen: v7x
topology: tpu7x:2x2x1
jax: 0.10.0
libtpu: 0.0.40
codegen_flags: <defaults>
</compile_context>

<pallas_src>
import functools

import jax
import jax.numpy as jnp
from jax import lax
from jax.experimental import pallas as pl
from jax.experimental.pallas import tpu as pltpu

_LN_EPS = 1e-5
_VMEM_LIMIT = 64 * 1024 * 1024


def _layernorm_f32(x, w, b):
    mean = jnp.mean(x, axis=-1, keepdims=True)
    var = jnp.mean((x - mean) ** 2, axis=-1, keepdims=True)
    return (x - mean) * lax.rsqrt(var + _LN_EPS) * w + b


# ---------------------------------------------------------------------------
# Kernel 1: LN1 + fused QKV proj + multi-head attention + output proj + residual
# ---------------------------------------------------------------------------

def _attn_block_kernel(x_ref, ln_w_ref, ln_b_ref,
                       wqkv_ref, bqkv_ref, wo_ref, bo_ref,
                       y_ref, attn_ref, *, n_heads, mxu_dtype):
    L, D = x_ref.shape
    dh = D // n_heads
    scale = 1.0 / (dh ** 0.5)

    # One HBM read of x serves both the residual and the LN input.
    x = x_ref[...].astype(jnp.float32)
    xn = _layernorm_f32(x, ln_w_ref[...].astype(jnp.float32),
                        ln_b_ref[...].astype(jnp.float32))
    xn_m = xn.astype(mxu_dtype)

    # Fused QKV projection: a single [L,D] @ [D,3D] MXU matmul, f32 accumulation.
    qkv = jnp.dot(xn_m, wqkv_ref[...],
                  preferred_element_type=jnp.float32) + bqkv_ref[...]

    # Fold softmax scale into q: O(L*D) VALU work instead of O(H*L^2).
    q = qkv[:, 0 * D:1 * D] * scale
    k = qkv[:, 1 * D:2 * D]
    v = qkv[:, 2 * D:3 * D]

    ctx_parts = []
    for h in range(n_heads):  # static, unrolled — n_heads is small
        sl = slice(h * dh, (h + 1) * dh)
        qh = q[:, sl].astype(mxu_dtype)
        kh = k[:, sl].astype(mxu_dtype)
        vh = v[:, sl].astype(mxu_dtype)
        # scores = qh @ kh^T without materializing the transpose (contract on dh).
        s = lax.dot_general(qh, kh, (((1,), (1,)), ((), ())),
                            preferred_element_type=jnp.float32)
        m = jnp.max(s, axis=-1, keepdims=True)
        p = jnp.exp(s - m)
        p = p * pl.reciprocal(jnp.sum(p, axis=-1, keepdims=True), approx=True)
        attn_ref[h, :, :] = p.astype(attn_ref.dtype)
        ctx_parts.append(jnp.dot(p.astype(mxu_dtype), vh,
                                 preferred_element_type=jnp.float32))

    ctx = jnp.concatenate(ctx_parts, axis=-1)          # [L, D], lane-dense
    out = jnp.dot(ctx.astype(mxu_dtype), wo_ref[...],
                  preferred_element_type=jnp.float32) + bo_ref[...]
    y_ref[...] = (x + out).astype(y_ref.dtype)         # residual (dropout = identity)


def attention_block(xf, params, *, B, L, n_heads,
                    mxu_dtype=jnp.bfloat16, attn_dtype=jnp.float32):
    """xf: [B*L, D] -> (x1 [B*L, D], attn [B, H, L, L])."""
    N, D = xf.shape
    assert N == B * L
    assert D % n_heads == 0
    assert L % 8 == 0 or B == 1, "sequence length must be a multiple of 8"

    # Fuse Q/K/V weights into one [D, 3D] matrix; cast weights to MXU dtype at the
    # call boundary (halves weight HBM traffic, keeps one wide lane-dense matmul).
    wqkv = jnp.concatenate(
        [params["wq"], params["wk"], params["wv"]], axis=1).astype(mxu_dtype)
    bqkv = jnp.concatenate(
        [params["bq"], params["bk"], params["bv"]], axis=1).astype(jnp.float32)
    wo = params["wo"].astype(mxu_dtype)

    row_spec = pl.BlockSpec((L, D), lambda b: (b, 0))
    vec_spec = pl.BlockSpec((1, D), lambda b: (0, 0))

    kern = functools.partial(_attn_block_kernel, n_heads=n_heads, mxu_dtype=mxu_dtype)
    return pl.pallas_call(
        kern,
        out_shape=(
            jax.ShapeDtypeStruct((N, D), xf.dtype),
            jax.ShapeDtypeStruct((B, n_heads, L, L), attn_dtype),
        ),
        grid=(B,),
        in_specs=[
            row_spec,                                         # x rows for this batch
            vec_spec, vec_spec,                               # ln1 w, b
            pl.BlockSpec((D, 3 * D), lambda b: (0, 0)),       # fused qkv weight
            pl.BlockSpec((1, 3 * D), lambda b: (0, 0)),       # fused qkv bias
            pl.BlockSpec((D, D), lambda b: (0, 0)),           # wo
            vec_spec,                                         # bo
        ],
        out_specs=(
            row_spec,
            pl.BlockSpec((None, n_heads, L, L), lambda b: (b, 0, 0, 0)),
        ),
        compiler_params=pltpu.CompilerParams(
            dimension_semantics=("parallel",),
            vmem_limit_bytes=_VMEM_LIMIT),
    )(xf, params["ln1_w"], params["ln1_b"],
      wqkv, bqkv, wo, params["bo"])


# ---------------------------------------------------------------------------
# Kernel 2: LN2 + FFN (conv1d k=1 == per-token linear) + residual
# ---------------------------------------------------------------------------

def _ffn_block_kernel(x_ref, ln_w_ref, ln_b_ref, w1_ref, b1_ref, w2_ref, b2_ref,
                      y_ref, *, activation, mxu_dtype):
    x = x_ref[...].astype(jnp.float32)
    xn = _layernorm_f32(x, ln_w_ref[...].astype(jnp.float32),
                        ln_b_ref[...].astype(jnp.float32))
    h = jnp.dot(xn.astype(mxu_dtype), w1_ref[...],
                preferred_element_type=jnp.float32) + b1_ref[...]
    if activation == "relu":
        h = jnp.maximum(h, 0.0)
    else:
        h = jax.nn.gelu(h, approximate=True)
    o = jnp.dot(h.astype(mxu_dtype), w2_ref[...],
                preferred_element_type=jnp.float32) + b2_ref[...]
    y_ref[...] = (x + o).astype(y_ref.dtype)            # residual (dropout = identity)


def ffn_block(x1, params, *, activation="relu", mxu_dtype=jnp.bfloat16, tm=256):
    """x1: [N, D] -> y [N, D], tiled over rows."""
    N, D = x1.shape
    d_ff = params["w_ff1"].shape[1]
    tm = N if N <= tm else tm                            # full block at small N

    w1 = params["w_ff1"].astype(mxu_dtype)
    w2 = params["w_ff2"].astype(mxu_dtype)

    kern = functools.partial(_ffn_block_kernel, activation=activation,
                             mxu_dtype=mxu_dtype)
    return pl.pallas_call(
        kern,
        out_shape=jax.ShapeDtypeStruct((N, D), x1.dtype),
        grid=(pl.cdiv(N, tm),),
        in_specs=[
            pl.BlockSpec((tm, D), lambda i: (i, 0)),
            pl.BlockSpec((1, D), lambda i: (0, 0)),
            pl.BlockSpec((1, D), lambda i: (0, 0)),
            pl.BlockSpec((D, d_ff), lambda i: (0, 0)),   # weights: constant block idx
            pl.BlockSpec((1, d_ff), lambda i: (0, 0)),
            pl.BlockSpec((d_ff, D), lambda i: (0, 0)),
            pl.BlockSpec((1, D), lambda i: (0, 0)),
        ],
        out_specs=pl.BlockSpec((tm, D), lambda i: (i, 0)),
        compiler_params=pltpu.CompilerParams(
            dimension_semantics=("parallel",),
            vmem_limit_bytes=_VMEM_LIMIT),
    )(x1, params["ln2_w"], params["ln2_b"], w1, params["b_ff1"], w2, params["b_ff2"])


# ---------------------------------------------------------------------------
# EncoderLayer_PreNorm forward
# ---------------------------------------------------------------------------

def encoder_layer_prenorm(x, params, n_heads, *, activation="relu",
                          mxu_dtype=jnp.bfloat16, attn_dtype=jnp.float32):
    """x: [B, L, D] -> (y [B, L, D], attn [B, H, L, L]).  Dropout = eval (identity)."""
    B, L, D = x.shape
    xf = x.reshape(B * L, D)                             # free (contiguous) reshape

    x1, attn = attention_block(xf, params, B=B, L=L, n_heads=n_heads,
                               mxu_dtype=mxu_dtype, attn_dtype=attn_dtype)
    y = ffn_block(x1, params, activation=activation, mxu_dtype=mxu_dtype)
    return y.reshape(B, L, D), attn


# ---------------------------------------------------------------------------
# Params, reference, and test
# ---------------------------------------------------------------------------

def init_params(key, d_model, d_ff, dtype=jnp.float32):
    ks = jax.random.split(key, 6)
    scale = 0.02

    def w(k, shape):
        return (scale * jax.random.normal(k, shape)).astype(dtype)

    return {
        "ln1_w": jnp.ones((1, d_model), dtype), "ln1_b": jnp.zeros((1, d_model), dtype),
        "ln2_w": jnp.ones((1, d_model), dtype), "ln2_b": jnp.zeros((1, d_model), dtype),
        "wq": w(ks[0], (d_model, d_model)), "bq": jnp.zeros((1, d_model), dtype),
        "wk": w(ks[1], (d_model, d_model)), "bk": jnp.zeros((1, d_model), dtype),
        "wv": w(ks[2], (d_model, d_model)), "bv": jnp.zeros((1, d_model), dtype),
        "wo": w(ks[3], (d_model, d_model)), "bo": jnp.zeros((1, d_model), dtype),
        "w_ff1": w(ks[4], (d_model, d_ff)), "b_ff1": jnp.zeros((1, d_ff), dtype),
        "w_ff2": w(ks[5], (d_ff, d_model)), "b_ff2": jnp.zeros((1, d_model), dtype),
    }


def _reference(x, params, n_heads):
    """Pure-JAX f32 reference of the PyTorch forward (eval mode)."""
    B, L, D = x.shape
    dh = D // n_heads
    xf = x.reshape(B * L, D)

    def ln(t, w, b):
        mu = jnp.mean(t, -1, keepdims=True)
        var = jnp.mean((t - mu) ** 2, -1, keepdims=True)
        return (t - mu) / jnp.sqrt(var + _LN_EPS) * w + b

    xn = ln(xf, params["ln1_w"], params["ln1_b"])
    q = (xn @ params["wq"] + params["bq"]).reshape(B, L, n_heads, dh).transpose(0, 2, 1, 3)
    k = (xn @ params["wk"] + params["bk"]).reshape(B, L, n_heads, dh).transpose(0, 2, 1, 3)
    v = (xn @ params["wv"] + params["bv"]).reshape(B, L, n_heads, dh).transpose(0, 2, 1, 3)
    s = jnp.einsum("bhqd,bhkd->bhqk", q, k) / (dh ** 0.5)
    a = jax.nn.softmax(s, axis=-1)
    o = jnp.einsum("bhqk,bhkd->bhqd", a, v).transpose(0, 2, 1, 3).reshape(B * L, D)
    x1 = xf + (o @ params["wo"] + params["bo"])
    xn2 = ln(x1, params["ln2_w"], params["ln2_b"])
    h = jnp.maximum(xn2 @ params["w_ff1"] + params["b_ff1"], 0.0)
    y = x1 + (h @ params["w_ff2"] + params["b_ff2"])
    return y.reshape(B, L, D), a


if __name__ == "__main__":
    B, L, d_model, n_heads = 2, 8, 32, 4
    d_ff = 4 * d_model  # 128

    key = jax.random.PRNGKey(0)
    k_x, k_p = jax.random.split(key)
    x = jax.random.normal(k_x, (B, L, d_model), dtype=jnp.float32)
    params = init_params(k_p, d_model, d_ff)

    fwd = jax.jit(functools.partial(encoder_layer_prenorm, n_heads=n_heads))
    y, attn = fwd(x, params)
    jax.block_until_ready((y, attn))

    assert y.shape == (B, L, d_model)
    assert attn.shape == (B, n_heads, L, L)

    y_ref, attn_ref = _reference(x, params, n_heads)
    assert jnp.max(jnp.abs(y - y_ref)) < 5e-2
    assert jnp.max(jnp.abs(attn - attn_ref)) < 5e-2

    print("KERNEL_OK")
</pallas_src>

<mosaic_0001>
module attributes {stable_mosaic.version = 11 : i64} {
  func.func @_attn_block_kernel(%arg0: i32, %arg1: memref<8x32xf32, #tpu.memory_space<vmem>>, %arg2: memref<1x32xf32, #tpu.memory_space<vmem>>, %arg3: memref<1x32xf32, #tpu.memory_space<vmem>>, %arg4: memref<32x96xbf16, #tpu.memory_space<vmem>>, %arg5: memref<1x96xf32, #tpu.memory_space<vmem>>, %arg6: memref<32x32xbf16, #tpu.memory_space<vmem>>, %arg7: memref<1x32xf32, #tpu.memory_space<vmem>>, %arg8: memref<8x32xf32, #tpu.memory_space<vmem>>, %arg9: memref<1x4x8x8xf32, #tpu.memory_space<vmem>>) attributes {dimension_semantics = [#tpu.dimension_semantics<parallel>], iteration_bounds = array<i64: 2>, scalar_prefetch = 0 : i64, scratch_operands = 0 : i64, tpu.core_type = #tpu.core_type<tc>, window_params = [{transform_indices = @transform_0, window_bounds = array<i64: 8, 32>}, {pipeline_mode = #tpu.pipeline_mode<synchronous>, transform_indices = @transform_1, window_bounds = array<i64: 1, 32>}, {pipeline_mode = #tpu.pipeline_mode<synchronous>, transform_indices = @transform_2, window_bounds = array<i64: 1, 32>}, {pipeline_mode = #tpu.pipeline_mode<synchronous>, transform_indices = @transform_3, window_bounds = array<i64: 32, 96>}, {pipeline_mode = #tpu.pipeline_mode<synchronous>, transform_indices = @transform_4, window_bounds = array<i64: 1, 96>}, {pipeline_mode = #tpu.pipeline_mode<synchronous>, transform_indices = @transform_5, window_bounds = array<i64: 32, 32>}, {pipeline_mode = #tpu.pipeline_mode<synchronous>, transform_indices = @transform_6, window_bounds = array<i64: 1, 32>}, {transform_indices = @transform_7, window_bounds = array<i64: 8, 32>}, {transform_indices = @transform_8, window_bounds = array<i64: 1, 4, 8, 8>}]} {
    %c0 = arith.constant 0 : index
    %c0_0 = arith.constant 0 : index
    %0 = vector.load %arg1[%c0, %c0_0] : memref<8x32xf32, #tpu.memory_space<vmem>>, vector<8x32xf32>
    %c0_1 = arith.constant 0 : index
    %c0_2 = arith.constant 0 : index
    %1 = vector.load %arg2[%c0_1, %c0_2] : memref<1x32xf32, #tpu.memory_space<vmem>>, vector<1x32xf32>
    %c0_3 = arith.constant 0 : index
    %c0_4 = arith.constant 0 : index
    %2 = vector.load %arg3[%c0_3, %c0_4] : memref<1x32xf32, #tpu.memory_space<vmem>>, vector<1x32xf32>
    %cst = arith.constant dense<0.000000e+00> : vector<8xf32>
    %3 = vector.multi_reduction <add>, %0, %cst [1] : vector<8x32xf32> to vector<8xf32>
    %4 = vector.shape_cast %3 : vector<8xf32> to vector<8x1xf32>
    %cst_5 = arith.constant 3.200000e+01 : f32
    %5 = vector.broadcast %cst_5 : f32 to vector<8x1xf32>
    %6 = arith.divf %4, %5 : vector<8x1xf32>
    %7 = vector.broadcast %6 : vector<8x1xf32> to vector<8x32xf32>
    %8 = arith.subf %0, %7 : vector<8x32xf32>
    %9 = arith.mulf %8, %8 : vector<8x32xf32>
    %cst_6 = arith.constant dense<0.000000e+00> : vector<8xf32>
    %10 = vector.multi_reduction <add>, %9, %cst_6 [1] : vector<8x32xf32> to vector<8xf32>
    %11 = vector.shape_cast %10 : vector<8xf32> to vector<8x1xf32>
    %cst_7 = arith.constant 3.200000e+01 : f32
    %12 = vector.broadcast %cst_7 : f32 to vector<8x1xf32>
    %13 = arith.divf %11, %12 : vector<8x1xf32>
    %14 = vector.broadcast %6 : vector<8x1xf32> to vector<8x32xf32>
    %15 = arith.subf %0, %14 : vector<8x32xf32>
    %cst_8 = arith.constant 9.99999974E-6 : f32
    %16 = vector.broadcast %cst_8 : f32 to vector<8x1xf32>
    %17 = arith.addf %13, %16 : vector<8x1xf32>
    %18 = math.rsqrt %17 : vector<8x1xf32>
    %19 = vector.broadcast %18 : vector<8x1xf32> to vector<8x32xf32>
    %20 = arith.mulf %15, %19 : vector<8x32xf32>
    %21 = vector.broadcast %1 : vector<1x32xf32> to vector<8x32xf32>
    %22 = arith.mulf %20, %21 : vector<8x32xf32>
    %23 = vector.broadcast %2 : vector<1x32xf32> to vector<8x32xf32>
    %24 = arith.addf %22, %23 : vector<8x32xf32>
    %25 = arith.truncf %24 : vector<8x32xf32> to vector<8x32xbf16>
    %c0_9 = arith.constant 0 : index
    %c0_10 = arith.constant 0 : index
    %26 = vector.load %arg4[%c0_9, %c0_10] : memref<32x96xbf16, #tpu.memory_space<vmem>>, vector<32x96xbf16>
    %cst_11 = arith.constant dense<0.000000e+00> : vector<8x96xf32>
    %27 = tpu.matmul %25, %26, %cst_11 {dimension_numbers = #tpu.dot_dimension_numbers<[1], [0], [0], [1], [0, 0, 1, 1], [], []>} : vector<8x32xbf16>, vector<32x96xbf16>, vector<8x96xf32> -> vector<8x96xf32>
    %c0_12 = arith.constant 0 : index
    %c0_13 = arith.constant 0 : index
    %28 = vector.load %arg5[%c0_12, %c0_13] : memref<1x96xf32, #tpu.memory_space<vmem>>, vector<1x96xf32>
    %29 = vector.broadcast %28 : vector<1x96xf32> to vector<8x96xf32>
    %30 = arith.addf %27, %29 : vector<8x96xf32>
    %31 = vector.extract_strided_slice %30 {offsets = [0, 0], sizes = [8, 32], strides = [1, 1]} : vector<8x96xf32> to vector<8x32xf32>
    %cst_14 = arith.constant 0.353553385 : f32
    %32 = vector.broadcast %cst_14 : f32 to vector<8x32xf32>
    %33 = arith.mulf %31, %32 : vector<8x32xf32>
    %34 = vector.extract_strided_slice %30 {offsets = [0, 32], sizes = [8, 32], strides = [1, 1]} : vector<8x96xf32> to vector<8x32xf32>
    %35 = vector.extract_strided_slice %30 {offsets = [0, 64], sizes = [8, 32], strides = [1, 1]} : vector<8x96xf32> to vector<8x32xf32>
    %36 = vector.extract_strided_slice %33 {offsets = [0, 0], sizes = [8, 8], strides = [1, 1]} : vector<8x32xf32> to vector<8x8xf32>
    %37 = arith.truncf %36 : vector<8x8xf32> to vector<8x8xbf16>
    %38 = vector.extract_strided_slice %34 {offsets = [0, 0], sizes = [8, 8], strides = [1, 1]} : vector<8x32xf32> to vector<8x8xf32>
    %39 = arith.truncf %38 : vector<8x8xf32> to vector<8x8xbf16>
    %40 = vector.extract_strided_slice %35 {offsets = [0, 0], sizes = [8, 8], strides = [1, 1]} : vector<8x32xf32> to vector<8x8xf32>
    %41 = arith.truncf %40 : vector<8x8xf32> to vector<8x8xbf16>
    %cst_15 = arith.constant dense<0.000000e+00> : vector<8x8xf32>
    %42 = tpu.matmul %37, %39, %cst_15 {dimension_numbers = #tpu.dot_dimension_numbers<[1], [1], [0], [0], [0, 0, 1, 0], [], []>} : vector<8x8xbf16>, vector<8x8xbf16>, vector<8x8xf32> -> vector<8x8xf32>
    %cst_16 = arith.constant dense<0xFF800000> : vector<8xf32>
    %43 = vector.multi_reduction <maximumf>, %42, %cst_16 [1] : vector<8x8xf32> to vector<8xf32>
    %44 = vector.shape_cast %43 : vector<8xf32> to vector<8x1xf32>
    %45 = vector.broadcast %44 : vector<8x1xf32> to vector<8x8xf32>
    %46 = arith.subf %42, %45 : vector<8x8xf32>
    %47 = math.exp %46 : vector<8x8xf32>
    %cst_17 = arith.constant dense<0.000000e+00> : vector<8xf32>
    %48 = vector.multi_reduction <add>, %47, %cst_17 [1] : vector<8x8xf32> to vector<8xf32>
    %49 = vector.shape_cast %48 : vector<8xf32> to vector<8x1xf32>
    %50 = tpu.reciprocal %49 {approx = true} : vector<8x1xf32> -> vector<8x1xf32>
    %51 = vector.broadcast %50 : vector<8x1xf32> to vector<8x8xf32>
    %52 = arith.mulf %47, %51 : vector<8x8xf32>
    %c0_18 = arith.constant 0 : index
    %c0_19 = arith.constant 0 : index
    %c0_20 = arith.constant 0 : index
    %c0_21 = arith.constant 0 : index
    %53 = vector.load %arg9[%c0_18, %c0_19, %c0_20, %c0_21] : memref<1x4x8x8xf32, #tpu.memory_space<vmem>>, vector<1x1x8x8xf32>
    %54 = vector.shape_cast %53 : vector<1x1x8x8xf32> to vector<8x8xf32>
    %55 = vector.shape_cast %52 : vector<8x8xf32> to vector<1x1x8x8xf32>
    tpu.vector_store %arg9[%c0_18, %c0_19, %c0_20, %c0_21], %55 {strides = array<i32>} : memref<1x4x8x8xf32, #tpu.memory_space<vmem>>, vector<1x1x8x8xf32>,
    %56 = arith.truncf %52 : vector<8x8xf32> to vector<8x8xbf16>
    %cst_22 = arith.constant dense<0.000000e+00> : vector<8x8xf32>
    %57 = tpu.matmul %56, %41, %cst_22 {dimension_numbers = #tpu.dot_dimension_numbers<[1], [0], [0], [1], [0, 0, 1, 1], [], []>} : vector<8x8xbf16>, vector<8x8xbf16>, vector<8x8xf32> -> vector<8x8xf32>
    %58 = vector.extract_strided_slice %33 {offsets = [0, 8], sizes = [8, 8], strides = [1, 1]} : vector<8x32xf32> to vector<8x8xf32>
    %59 = arith.truncf %58 : vector<8x8xf32> to vector<8x8xbf16>
    %60 = vector.extract_strided_slice %34 {offsets = [0, 8], sizes = [8, 8], strides = [1, 1]} : vector<8x32xf32> to vector<8x8xf32>
    %61 = arith.truncf %60 : vector<8x8xf32> to vector<8x8xbf16>
    %62 = vector.extract_strided_slice %35 {offsets = [0, 8], sizes = [8, 8], strides = [1, 1]} : vector<8x32xf32> to vector<8x8xf32>
    %63 = arith.truncf %62 : vector<8x8xf32> to vector<8x8xbf16>
    %cst_23 = arith.constant dense<0.000000e+00> : vector<8x8xf32>
    %64 = tpu.matmul %59, %61, %cst_23 {dimension_numbers = #tpu.dot_dimension_numbers<[1], [1], [0], [0], [0, 0, 1, 0], [], []>} : vector<8x8xbf16>, vector<8x8xbf16>, vector<8x8xf32> -> vector<8x8xf32>
    %cst_24 = arith.constant dense<0xFF800000> : vector<8xf32>
    %65 = vector.multi_reduction <maximumf>, %64, %cst_24 [1] : vector<8x8xf32> to vector<8xf32>
    %66 = vector.shape_cast %65 : vector<8xf32> to vector<8x1xf32>
    %67 = vector.broadcast %66 : vector<8x1xf32> to vector<8x8xf32>
    %68 = arith.subf %64, %67 : vector<8x8xf32>
    %69 = math.exp %68 : vector<8x8xf32>
    %cst_25 = arith.constant dense<0.000000e+00> : vector<8xf32>
    %70 = vector.multi_reduction <add>, %69, %cst_25 [1] : vector<8x8xf32> to vector<8xf32>
    %71 = vector.shape_cast %70 : vector<8xf32> to vector<8x1xf32>
    %72 = tpu.reciprocal %71 {approx = true} : vector<8x1xf32> -> vector<8x1xf32>
    %73 = vector.broadcast %72 : vector<8x1xf32> to vector<8x8xf32>
    %74 = arith.mulf %69, %73 : vector<8x8xf32>
    %c0_26 = arith.constant 0 : index
    %c1 = arith.constant 1 : index
    %c0_27 = arith.constant 0 : index
    %c0_28 = arith.constant 0 : index
    %75 = vector.load %arg9[%c0_26, %c1, %c0_27, %c0_28] : memref<1x4x8x8xf32, #tpu.memory_space<vmem>>, vector<1x1x8x8xf32>
    %76 = vector.shape_cast %75 : vector<1x1x8x8xf32> to vector<8x8xf32>
    %77 = vector.shape_cast %74 : vector<8x8xf32> to vector<1x1x8x8xf32>
    tpu.vector_store %arg9[%c0_26, %c1, %c0_27, %c0_28], %77 {strides = array<i32>} : memref<1x4x8x8xf32, #tpu.memory_space<vmem>>, vector<1x1x8x8xf32>,
    %78 = arith.truncf %74 : vector<8x8xf32> to vector<8x8xbf16>
    %cst_29 = arith.constant dense<0.000000e+00> : vector<8x8xf32>
    %79 = tpu.matmul %78, %63, %cst_29 {dimension_numbers = #tpu.dot_dimension_numbers<[1], [0], [0], [1], [0, 0, 1, 1], [], []>} : vector<8x8xbf16>, vector<8x8xbf16>, vector<8x8xf32> -> vector<8x8xf32>
    %80 = vector.extract_strided_slice %33 {offsets = [0, 16], sizes = [8, 8], strides = [1, 1]} : vector<8x32xf32> to vector<8x8xf32>
    %81 = arith.truncf %80 : vector<8x8xf32> to vector<8x8xbf16>
    %82 = vector.extract_strided_slice %34 {offsets = [0, 16], sizes = [8, 8], strides = [1, 1]} : vector<8x32xf32> to vector<8x8xf32>
    %83 = arith.truncf %82 : vector<8x8xf32> to vector<8x8xbf16>
    %84 = vector.extract_strided_slice %35 {offsets = [0, 16], sizes = [8, 8], strides = [1, 1]} : vector<8x32xf32> to vector<8x8xf32>
    %85 = arith.truncf %84 : vector<8x8xf32> to vector<8x8xbf16>
    %cst_30 = arith.constant dense<0.000000e+00> : vector<8x8xf32>
    %86 = tpu.matmul %81, %83, %cst_30 {dimension_numbers = #tpu.dot_dimension_numbers<[1], [1], [0], [0], [0, 0, 1, 0], [], []>} : vector<8x8xbf16>, vector<8x8xbf16>, vector<8x8xf32> -> vector<8x8xf32>
    %cst_31 = arith.constant dense<0xFF800000> : vector<8xf32>
    %87 = vector.multi_reduction <maximumf>, %86, %cst_31 [1] : vector<8x8xf32> to vector<8xf32>
    %88 = vector.shape_cast %87 : vector<8xf32> to vector<8x1xf32>
    %89 = vector.broadcast %88 : vector<8x1xf32> to vector<8x8xf32>
    %90 = arith.subf %86, %89 : vector<8x8xf32>
    %91 = math.exp %90 : vector<8x8xf32>
    %cst_32 = arith.constant dense<0.000000e+00> : vector<8xf32>
    %92 = vector.multi_reduction <add>, %91, %cst_32 [1] : vector<8x8xf32> to vector<8xf32>
    %93 = vector.shape_cast %92 : vector<8xf32> to vector<8x1xf32>
    %94 = tpu.reciprocal %93 {approx = true} : vector<8x1xf32> -> vector<8x1xf32>
    %95 = vector.broadcast %94 : vector<8x1xf32> to vector<8x8xf32>
    %96 = arith.mulf %91, %95 : vector<8x8xf32>
    %c0_33 = arith.constant 0 : index
    %c2 = arith.constant 2 : index
    %c0_34 = arith.constant 0 : index
    %c0_35 = arith.constant 0 : index
    %97 = vector.load %arg9[%c0_33, %c2, %c0_34, %c0_35] : memref<1x4x8x8xf32, #tpu.memory_space<vmem>>, vector<1x1x8x8xf32>
    %98 = vector.shape_cast %97 : vector<1x1x8x8xf32> to vector<8x8xf32>
    %99 = vector.shape_cast %96 : vector<8x8xf32> to vector<1x1x8x8xf32>
    tpu.vector_store %arg9[%c0_33, %c2, %c0_34, %c0_35], %99 {strides = array<i32>} : memref<1x4x8x8xf32, #tpu.memory_space<vmem>>, vector<1x1x8x8xf32>,
    %100 = arith.truncf %96 : vector<8x8xf32> to vector<8x8xbf16>
    %cst_36 = arith.constant dense<0.000000e+00> : vector<8x8xf32>
    %101 = tpu.matmul %100, %85, %cst_36 {dimension_numbers = #tpu.dot_dimension_numbers<[1], [0], [0], [1], [0, 0, 1, 1], [], []>} : vector<8x8xbf16>, vector<8x8xbf16>, vector<8x8xf32> -> vector<8x8xf32>
    %102 = vector.extract_strided_slice %33 {offsets = [0, 24], sizes = [8, 8], strides = [1, 1]} : vector<8x32xf32> to vector<8x8xf32>
    %103 = arith.truncf %102 : vector<8x8xf32> to vector<8x8xbf16>
    %104 = vector.extract_strided_slice %34 {offsets = [0, 24], sizes = [8, 8], strides = [1, 1]} : vector<8x32xf32> to vector<8x8xf32>
    %105 = arith.truncf %104 : vector<8x8xf32> to vector<8x8xbf16>
    %106 = vector.extract_strided_slice %35 {offsets = [0, 24], sizes = [8, 8], strides = [1, 1]} : vector<8x32xf32> to vector<8x8xf32>
    %107 = arith.truncf %106 : vector<8x8xf32> to vector<8x8xbf16>
    %cst_37 = arith.constant dense<0.000000e+00> : vector<8x8xf32>
    %108 = tpu.matmul %103, %105, %cst_37 {dimension_numbers = #tpu.dot_dimension_numbers<[1], [1], [0], [0], [0, 0, 1, 0], [], []>} : vector<8x8xbf16>, vector<8x8xbf16>, vector<8x8xf32> -> vector<8x8xf32>
    %cst_38 = arith.constant dense<0xFF800000> : vector<8xf32>
    %109 = vector.multi_reduction <maximumf>, %108, %cst_38 [1] : vector<8x8xf32> to vector<8xf32>
    %110 = vector.shape_cast %109 : vector<8xf32> to vector<8x1xf32>
    %111 = vector.broadcast %110 : vector<8x1xf32> to vector<8x8xf32>
    %112 = arith.subf %108, %111 : vector<8x8xf32>
    %113 = math.exp %112 : vector<8x8xf32>
    %cst_39 = arith.constant dense<0.000000e+00> : vector<8xf32>
    %114 = vector.multi_reduction <add>, %113, %cst_39 [1] : vector<8x8xf32> to vector<8xf32>
    %115 = vector.shape_cast %114 : vector<8xf32> to vector<8x1xf32>
    %116 = tpu.reciprocal %115 {approx = true} : vector<8x1xf32> -> vector<8x1xf32>
    %117 = vector.broadcast %116 : vector<8x1xf32> to vector<8x8xf32>
    %118 = arith.mulf %113, %117 : vector<8x8xf32>
    %c0_40 = arith.constant 0 : index
    %c3 = arith.constant 3 : index
    %c0_41 = arith.constant 0 : index
    %c0_42 = arith.constant 0 : index
    %119 = vector.load %arg9[%c0_40, %c3, %c0_41, %c0_42] : memref<1x4x8x8xf32, #tpu.memory_space<vmem>>, vector<1x1x8x8xf32>
    %120 = vector.shape_cast %119 : vector<1x1x8x8xf32> to vector<8x8xf32>
    %121 = vector.shape_cast %118 : vector<8x8xf32> to vector<1x1x8x8xf32>
    tpu.vector_store %arg9[%c0_40, %c3, %c0_41, %c0_42], %121 {strides = array<i32>} : memref<1x4x8x8xf32, #tpu.memory_space<vmem>>, vector<1x1x8x8xf32>,
    %122 = arith.truncf %118 : vector<8x8xf32> to vector<8x8xbf16>
    %cst_43 = arith.constant dense<0.000000e+00> : vector<8x8xf32>
    %123 = tpu.matmul %122, %107, %cst_43 {dimension_numbers = #tpu.dot_dimension_numbers<[1], [0], [0], [1], [0, 0, 1, 1], [], []>} : vector<8x8xbf16>, vector<8x8xbf16>, vector<8x8xf32> -> vector<8x8xf32>
    %124 = tpu.concatenate %57, %79, %101, %123 in 1 : vector<8x8xf32>, vector<8x8xf32>, vector<8x8xf32>, vector<8x8xf32> -> vector<8x32xf32>
    %125 = arith.truncf %124 : vector<8x32xf32> to vector<8x32xbf16>
    %c0_44 = arith.constant 0 : index
    %c0_45 = arith.constant 0 : index
    %126 = vector.load %arg6[%c0_44, %c0_45] : memref<32x32xbf16, #tpu.memory_space<vmem>>, vector<32x32xbf16>
    %cst_46 = arith.constant dense<0.000000e+00> : vector<8x32xf32>
    %127 = tpu.matmul %125, %126, %cst_46 {dimension_numbers = #tpu.dot_dimension_numbers<[1], [0], [0], [1], [0, 0, 1, 1], [], []>} : vector<8x32xbf16>, vector<32x32xbf16>, vector<8x32xf32> -> vector<8x32xf32>
    %c0_47 = arith.constant 0 : index
    %c0_48 = arith.constant 0 : index
    %128 = vector.load %arg7[%c0_47, %c0_48] : memref<1x32xf32, #tpu.memory_space<vmem>>, vector<1x32xf32>
    %129 = vector.broadcast %128 : vector<1x32xf32> to vector<8x32xf32>
    %130 = arith.addf %127, %129 : vector<8x32xf32>
    %131 = arith.addf %0, %130 : vector<8x32xf32>
    %c0_49 = arith.constant 0 : index
    %c0_50 = arith.constant 0 : index
    %132 = vector.load %arg8[%c0_49, %c0_50] : memref<8x32xf32, #tpu.memory_space<vmem>>, vector<8x32xf32>
    tpu.vector_store %arg8[%c0_49, %c0_50], %131 {strides = array<i32>} : memref<8x32xf32, #tpu.memory_space<vmem>>, vector<8x32xf32>,
    return
  }
  func.func @transform_0(%arg0: i32) -> (i32, i32) {
    %c0_i32 = arith.constant 0 : i32
    %c0_i32_0 = arith.constant 0 : i32
    return %arg0, %c0_i32 : i32, i32
  }
  func.func @transform_1(%arg0: i32) -> (i32, i32) {
    %c0_i32 = arith.constant 0 : i32
    %c0_i32_0 = arith.constant 0 : i32
    %c0_i32_1 = arith.constant 0 : i32
    return %c0_i32, %c0_i32_0 : i32, i32
  }
  func.func @transform_2(%arg0: i32) -> (i32, i32) {
    %c0_i32 = arith.constant 0 : i32
    %c0_i32_0 = arith.constant 0 : i32
    %c0_i32_1 = arith.constant 0 : i32
    return %c0_i32, %c0_i32_0 : i32, i32
  }
  func.func @transform_3(%arg0: i32) -> (i32, i32) {
    %c0_i32 = arith.constant 0 : i32
    %c0_i32_0 = arith.constant 0 : i32
    %c0_i32_1 = arith.constant 0 : i32
    return %c0_i32, %c0_i32_0 : i32, i32
  }
  func.func @transform_4(%arg0: i32) -> (i32, i32) {
    %c0_i32 = arith.constant 0 : i32
    %c0_i32_0 = arith.constant 0 : i32
    %c0_i32_1 = arith.constant 0 : i32
    return %c0_i32, %c0_i32_0 : i32, i32
  }
  func.func @transform_5(%arg0: i32) -> (i32, i32) {
    %c0_i32 = arith.constant 0 : i32
    %c0_i32_0 = arith.constant 0 : i32
    %c0_i32_1 = arith.constant 0 : i32
    return %c0_i32, %c0_i32_0 : i32, i32
  }
  func.func @transform_6(%arg0: i32) -> (i32, i32) {
    %c0_i32 = arith.constant 0 : i32
    %c0_i32_0 = arith.constant 0 : i32
    %c0_i32_1 = arith.constant 0 : i32
    return %c0_i32, %c0_i32_0 : i32, i32
  }
  func.func @transform_7(%arg0: i32) -> (i32, i32) {
    %c0_i32 = arith.constant 0 : i32
    %c0_i32_0 = arith.constant 0 : i32
    return %arg0, %c0_i32 : i32, i32
  }
  func.func @transform_8(%arg0: i32) -> (i32, i32, i32, i32) {
    %c0_i32 = arith.constant 0 : i32
    %c0_i32_0 = arith.constant 0 : i32
    %c0_i32_1 = arith.constant 0 : i32
    %c0_i32_2 = arith.constant 0 : i32
    return %arg0, %c0_i32, %c0_i32_0, %c0_i32_1 : i32, i32, i32, i32
  }
}

module attributes {stable_mosaic.version = 11 : i64} {
  func.func @_ffn_block_kernel(%arg0: i32, %arg1: memref<16x32xf32, #tpu.memory_space<vmem>>, %arg2: memref<1x32xf32, #tpu.memory_space<vmem>>, %arg3: memref<1x32xf32, #tpu.memory_space<vmem>>, %arg4: memref<32x128xbf16, #tpu.memory_space<vmem>>, %arg5: memref<1x128xf32, #tpu.memory_space<vmem>>, %arg6: memref<128x32xbf16, #tpu.memory_space<vmem>>, %arg7: memref<1x32xf32, #tpu.memory_space<vmem>>, %arg8: memref<16x32xf32, #tpu.memory_space<vmem>>) attributes {dimension_semantics = [#tpu.dimension_semantics<parallel>], iteration_bounds = array<i64: 1>, scalar_prefetch = 0 : i64, scratch_operands = 0 : i64, tpu.core_type = #tpu.core_type<tc>, window_params = [{transform_indices = @transform_0, window_bounds = array<i64: 16, 32>}, {pipeline_mode = #tpu.pipeline_mode<synchronous>, transform_indices = @transform_1, window_bounds = array<i64: 1, 32>}, {pipeline_mode = #tpu.pipeline_mode<synchronous>, transform_indices = @transform_2, window_bounds = array<i64: 1, 32>}, {pipeline_mode = #tpu.pipeline_mode<synchronous>, transform_indices = @transform_3, window_bounds = array<i64: 32, 128>}, {pipeline_mode = #tpu.pipeline_mode<synchronous>, transform_indices = @transform_4, window_bounds = array<i64: 1, 128>}, {pipeline_mode = #tpu.pipeline_mode<synchronous>, transform_indices = @transform_5, window_bounds = array<i64: 128, 32>}, {pipeline_mode = #tpu.pipeline_mode<synchronous>, transform_indices = @transform_6, window_bounds = array<i64: 1, 32>}, {transform_indices = @transform_7, window_bounds = array<i64: 16, 32>}]} {
    %c0 = arith.constant 0 : index
    %c0_0 = arith.constant 0 : index
    %0 = vector.load %arg1[%c0, %c0_0] : memref<16x32xf32, #tpu.memory_space<vmem>>, vector<16x32xf32>
    %c0_1 = arith.constant 0 : index
    %c0_2 = arith.constant 0 : index
    %1 = vector.load %arg2[%c0_1, %c0_2] : memref<1x32xf32, #tpu.memory_space<vmem>>, vector<1x32xf32>
    %c0_3 = arith.constant 0 : index
    %c0_4 = arith.constant 0 : index
    %2 = vector.load %arg3[%c0_3, %c0_4] : memref<1x32xf32, #tpu.memory_space<vmem>>, vector<1x32xf32>
    %cst = arith.constant dense<0.000000e+00> : vector<16xf32>
    %3 = vector.multi_reduction <add>, %0, %cst [1] : vector<16x32xf32> to vector<16xf32>
    %4 = vector.shape_cast %3 : vector<16xf32> to vector<16x1xf32>
    %cst_5 = arith.constant 3.200000e+01 : f32
    %5 = vector.broadcast %cst_5 : f32 to vector<16x1xf32>
    %6 = arith.divf %4, %5 : vector<16x1xf32>
    %7 = vector.broadcast %6 : vector<16x1xf32> to vector<16x32xf32>
    %8 = arith.subf %0, %7 : vector<16x32xf32>
    %9 = arith.mulf %8, %8 : vector<16x32xf32>
    %cst_6 = arith.constant dense<0.000000e+00> : vector<16xf32>
    %10 = vector.multi_reduction <add>, %9, %cst_6 [1] : vector<16x32xf32> to vector<16xf32>
    %11 = vector.shape_cast %10 : vector<16xf32> to vector<16x1xf32>
    %cst_7 = arith.constant 3.200000e+01 : f32
    %12 = vector.broadcast %cst_7 : f32 to vector<16x1xf32>
    %13 = arith.divf %11, %12 : vector<16x1xf32>
    %14 = vector.broadcast %6 : vector<16x1xf32> to vector<16x32xf32>
    %15 = arith.subf %0, %14 : vector<16x32xf32>
    %cst_8 = arith.constant 9.99999974E-6 : f32
    %16 = vector.broadcast %cst_8 : f32 to vector<16x1xf32>
    %17 = arith.addf %13, %16 : vector<16x1xf32>
    %18 = math.rsqrt %17 : vector<16x1xf32>
    %19 = vector.broadcast %18 : vector<16x1xf32> to vector<16x32xf32>
    %20 = arith.mulf %15, %19 : vector<16x32xf32>
    %21 = vector.broadcast %1 : vector<1x32xf32> to vector<16x32xf32>
    %22 = arith.mulf %20, %21 : vector<16x32xf32>
    %23 = vector.broadcast %2 : vector<1x32xf32> to vector<16x32xf32>
    %24 = arith.addf %22, %23 : vector<16x32xf32>
    %25 = arith.truncf %24 : vector<16x32xf32> to vector<16x32xbf16>
    %c0_9 = arith.constant 0 : index
    %c0_10 = arith.constant 0 : index
    %26 = vector.load %arg4[%c0_9, %c0_10] : memref<32x128xbf16, #tpu.memory_space<vmem>>, vector<32x128xbf16>
    %cst_11 = arith.constant dense<0.000000e+00> : vector<16x128xf32>
    %27 = tpu.matmul %25, %26, %cst_11 {dimension_numbers = #tpu.dot_dimension_numbers<[1], [0], [0], [1], [0, 0, 1, 1], [], []>} : vector<16x32xbf16>, vector<32x128xbf16>, vector<16x128xf32> -> vector<16x128xf32>
    %c0_12 = arith.constant 0 : index
    %c0_13 = arith.constant 0 : index
    %28 = vector.load %arg5[%c0_12, %c0_13] : memref<1x128xf32, #tpu.memory_space<vmem>>, vector<1x128xf32>
    %29 = vector.broadcast %28 : vector<1x128xf32> to vector<16x128xf32>
    %30 = arith.addf %27, %29 : vector<16x128xf32>
    %cst_14 = arith.constant 0.000000e+00 : f32
    %31 = vector.broadcast %cst_14 : f32 to vector<16x128xf32>
    %32 = arith.maximumf %30, %31 : vector<16x128xf32>
    %33 = arith.truncf %32 : vector<16x128xf32> to vector<16x128xbf16>
    %c0_15 = arith.constant 0 : index
    %c0_16 = arith.constant 0 : index
    %34 = vector.load %arg6[%c0_15, %c0_16] : memref<128x32xbf16, #tpu.memory_space<vmem>>, vector<128x32xbf16>
    %cst_17 = arith.constant dense<0.000000e+00> : vector<16x32xf32>
    %35 = tpu.matmul %33, %34, %cst_17 {dimension_numbers = #tpu.dot_dimension_numbers<[1], [0], [0], [1], [0, 0, 1, 1], [], []>} : vector<16x128xbf16>, vector<128x32xbf16>, vector<16x32xf32> -> vector<16x32xf32>
    %c0_18 = arith.constant 0 : index
    %c0_19 = arith.constant 0 : index
    %36 = vector.load %arg7[%c0_18, %c0_19] : memref<1x32xf32, #tpu.memory_space<vmem>>, vector<1x32xf32>
    %37 = vector.broadcast %36 : vector<1x32xf32> to vector<16x32xf32>
    %38 = arith.addf %35, %37 : vector<16x32xf32>
    %39 = arith.addf %0, %38 : vector<16x32xf32>
    %c0_20 = arith.constant 0 : index
    %c0_21 = arith.constant 0 : index
    %40 = vector.load %arg8[%c0_20, %c0_21] : memref<16x32xf32, #tpu.memory_space<vmem>>, vector<16x32xf32>
    tpu.vector_store %arg8[%c0_20, %c0_21], %39 {strides = array<i32>} : memref<16x32xf32, #tpu.memory_space<vmem>>, vector<16x32xf32>,
    return
  }
  func.func @transform_0(%arg0: i32) -> (i32, i32) {
    %c0_i32 = arith.constant 0 : i32
    %c0_i32_0 = arith.constant 0 : i32
    return %arg0, %c0_i32 : i32, i32
  }
  func.func @transform_1(%arg0: i32) -> (i32, i32) {
    %c0_i32 = arith.constant 0 : i32
    %c0_i32_0 = arith.constant 0 : i32
    %c0_i32_1 = arith.constant 0 : i32
    return %c0_i32, %c0_i32_0 : i32, i32
  }
  func.func @transform_2(%arg0: i32) -> (i32, i32) {
    %c0_i32 = arith.constant 0 : i32
    %c0_i32_0 = arith.constant 0 : i32
    %c0_i32_1 = arith.constant 0 : i32
    return %c0_i32, %c0_i32_0 : i32, i32
  }
  func.func @transform_3(%arg0: i32) -> (i32, i32) {
    %c0_i32 = arith.constant 0 : i32
    %c0_i32_0 = arith.constant 0 : i32
    %c0_i32_1 = arith.constant 0 : i32
    return %c0_i32, %c0_i32_0 : i32, i32
  }
  func.func @transform_4(%arg0: i32) -> (i32, i32) {
    %c0_i32 = arith.constant 0 : i32
    %c0_i32_0 = arith.constant 0 : i32
    %c0_i32_1 = arith.constant 0 : i32
    return %c0_i32, %c0_i32_0 : i32, i32
  }
  func.func @transform_5(%arg0: i32) -> (i32, i32) {
    %c0_i32 = arith.constant 0 : i32
    %c0_i32_0 = arith.constant 0 : i32
    %c0_i32_1 = arith.constant 0 : i32
    return %c0_i32, %c0_i32_0 : i32, i32
  }
  func.func @transform_6(%arg0: i32) -> (i32, i32) {
    %c0_i32 = arith.constant 0 : i32
    %c0_i32_0 = arith.constant 0 : i32
    %c0_i32_1 = arith.constant 0 : i32
    return %c0_i32, %c0_i32_0 : i32, i32
  }
  func.func @transform_7(%arg0: i32) -> (i32, i32) {
    %c0_i32 = arith.constant 0 : i32
    %c0_i32_0 = arith.constant 0 : i32
    return %arg0, %c0_i32 : i32, i32
  }
}

</mosaic_0001>

<bundles_post_ra>
// kernel: encoder_layer_prenorm.3
= control target key start
LH: loop header
LB: loop body
LE: loop exit
PB: predicated region body
PF: predicated region fallthrough
CT: control target
= control target key end

     0   :  { %12 = vsyncpa [#allocation3], 0  ;;  %s826_s0 = inlined_call_operand.hbm [shape: f32[16,32], index: 0, kind: input, shape index: {}]   ;;  %s827_s1 = inlined_call_operand.hbm [shape: f32[1,32], index: 1, kind: input, shape index: {}]   ;;  %s828_s2 = inlined_call_operand.hbm [shape: f32[1,32], index: 2, kind: input, shape index: {}]   ;;  %s829_s3 = inlined_call_operand.hbm [shape: bf16[32,128], index: 3, kind: input, shape index: {}]   ;;  %s830_s4 = inlined_call_operand.hbm [shape: f32[1,128], index: 4, kind: input, shape index: {}]   ;;  %s831_s5 = inlined_call_operand.hbm [shape: bf16[128,32], index: 5, kind: input, shape index: {}]   ;;  %s832_s6 = inlined_call_operand.hbm [shape: f32[1,32], index: 6, kind: input, shape index: {}]   ;;  %s833_s7 = inlined_call_operand.hbm [shape: f32[16,32], index: 7, kind: output, shape index: {}]  }
   0x1   :  { %13 = vsyncpa [#allocation6], 0 }
   0x2   :  { %14 = vsyncpa [#allocation9], 0 }
   0x3   :  { %15 = vsyncpa [#allocation12], 0 }
   0x4   :  { %16 = vsyncpa [#allocation4], 0  ;;  %s639_s24 = smov [#allocation5]   ;;  %s640_s26 = smov [#allocation8]  }
   0x5   :  { %s35_s25 = sshll.u32 %s639_s24, 4  ;;  %s54_s27 = sshll.u32 %s640_s26, 4  ;;  %s36_s25 = int_to_ptr.vmem [resolvable:$true] %s35_s25  ;;  %s693_s27 = int_to_ptr.vmem [resolvable:$true] %s54_s27 }
   0x6   :  { %s453_s30 = scalar_lea.hbm %s827_s1, 16 }
   0x7   :  { %p454_p0 = scmp.ne.s32.totalorder %s827_s1, %s453_s30  ;;  %p457_p1 = scmp.lt.u32.totalorder %s453_s30, %s827_s1 }
   0x9   :  { %p459_p2 = pnand %p457_p1, %p454_p0 }
   0xb   :  { %462 = shalt.err (!%p459_p2)
}
   0xc   :  { %s463_s12 = scalar_lea.vmem %s36_s25, 16  ;;  %s467_s13 = scalar_lea.vmem %s36_s25, 32 }
   0xd   :  { %p464_p3 = scmp.ne.s32.totalorder %s36_s25, %s463_s12  ;;  %p468_p4 = scmp.lt.s32.totalorder %s36_s25, %s36_s25 }
   0xe   :  { %p469_p5 = scmp.lt.s32.totalorder %s467_s13, %s463_s12 }
  0x10   :  { %p470_p6 = por %p469_p5, %p468_p4 }
  0x12   :  { %p471_p7 = pnand %p470_p6, %p464_p3 }
  0x14   :  { %474 = shalt.err (!%p471_p7)
}
  0x15   :  { %38 = dma.hbm_to_vmem [thread:$0]  %s827_s1, 16, %s36_s25, [#allocation6]  }
  0x16   :  { %s475_s18 = scalar_lea.hbm %s829_s3, 256 }
  0x17   :  { %p476_p8 = scmp.ne.s32.totalorder %s829_s3, %s475_s18  ;;  %p479_p9 = scmp.lt.u32.totalorder %s475_s18, %s829_s3 }
  0x19   :  { %p481_p10 = pnand %p479_p9, %p476_p8 }
  0x1b   :  { %484 = shalt.err (!%p481_p10)
}
  0x1c   :  { %s485_s23 = scalar_lea.vmem %s693_s27, 256  ;;  %p490_p12 = scmp.lt.s32.totalorder %s693_s27, %s693_s27 }
  0x1d   :  { %p486_p11 = scmp.ne.s32.totalorder %s693_s27, %s485_s23  ;;  %p491_p13 = scmp.lt.s32.totalorder %s485_s23, %s485_s23 }
  0x1f   :  { %p492_p0 = por %p491_p13, %p490_p12 }
  0x21   :  { %p493_p1 = pnand %p492_p0, %p486_p11 }
  0x23   :  { %496 = shalt.err (!%p493_p1)
}
  0x24   :  { %s641_s1 = smov 64   ;;  %s642_s24 = smov 4  }
  0x25   :  { %60 = dma.hbm_to_vmem [thread:$0]  %s829_s3, 256, %s693_s27, [#allocation9], %s641_s1, %s641_s1, %s642_s24  }
  0x26   :  { %s643_s28 = smov [#allocation11]   ;;  %s644_s30 = smov [#allocation2]  }
  0x27   :  { %s76_s29 = sshll.u32 %s643_s28, 4  ;;  %s22_s8 = sshll.u32 %s644_s30, 4  ;;  %s77_s29 = int_to_ptr.vmem [resolvable:$true] %s76_s29  ;;  %s724_s8 = int_to_ptr.vmem [resolvable:$true] %s22_s8 }
  0x28   :  { %s497_s11 = scalar_lea.hbm %s831_s5, 1024 }
  0x29   :  { %p498_p2 = scmp.ne.s32.totalorder %s831_s5, %s497_s11  ;;  %p501_p3 = scmp.lt.u32.totalorder %s497_s11, %s831_s5 }
  0x2b   :  { %p503_p4 = pnand %p501_p3, %p498_p2 }
  0x2d   :  { %506 = shalt.err (!%p503_p4)
}
  0x2e   :  { %s507_s3 = scalar_lea.vmem %s77_s29, 1024  ;;  %p512_p6 = scmp.lt.s32.totalorder %s77_s29, %s77_s29 }
  0x2f   :  { %p508_p5 = scmp.ne.s32.totalorder %s77_s29, %s507_s3  ;;  %p513_p7 = scmp.lt.s32.totalorder %s507_s3, %s507_s3 }
  0x31   :  { %p514_p8 = por %p513_p7, %p512_p6 }
  0x33   :  { %p515_p9 = pnand %p514_p8, %p508_p5 }
  0x35   :  { %518 = shalt.err (!%p515_p9)
}
  0x36   :  { %82 = dma.hbm_to_vmem [thread:$0]  %s831_s5, 1024, %s77_s29, [#allocation12], %s641_s1, %s641_s1, %s642_s24  }
  0x37   :  { %s519_s19 = scalar_lea.hbm %s826_s0, 256 }
  0x38   :  { %p520_p10 = scmp.ne.s32.totalorder %s826_s0, %s519_s19  ;;  %p523_p11 = scmp.lt.u32.totalorder %s519_s19, %s826_s0 }
  0x3a   :  { %p525_p12 = pnand %p523_p11, %p520_p10 }
  0x3c   :  { %528 = shalt.err (!%p525_p12)
}
  0x3d   :  { %s529_s25 = scalar_lea.vmem %s724_s8, 256  ;;  %p534_p0 = scmp.lt.s32.totalorder %s724_s8, %s724_s8 }
  0x3e   :  { %p530_p13 = scmp.ne.s32.totalorder %s724_s8, %s529_s25  ;;  %p535_p1 = scmp.lt.s32.totalorder %s529_s25, %s529_s25 }
  0x40   :  { %p536_p2 = por %p535_p1, %p534_p0 }
  0x42   :  { %p537_p3 = pnand %p536_p2, %p530_p13 }
  0x44   :  { %540 = shalt.err (!%p537_p3)
}
  0x45   :  { %s645_s5 = smov 128   ;;  %s646_s1 = smov 8  }
  0x46   :  { %28 = dma.hbm_to_vmem [thread:$0]  %s826_s0, 256, %s724_s8, [#allocation3], %s645_s5, %s645_s5, %s646_s1  }
  0x47   :  { %s647_s28 = smov [#allocation7]   ;;  %s648_s30 = smov [#allocation10]  }
  0x48   :  { %s45_s29 = sshll.u32 %s647_s28, 4  ;;  %s67_s9 = sshll.u32 %s648_s30, 4  ;;  %s46_s29 = int_to_ptr.vmem [resolvable:$true] %s45_s29  ;;  %s68_s9 = int_to_ptr.vmem [resolvable:$true] %s67_s9 }
  0x49   :  { %s541_s12 = scalar_lea.hbm %s828_s2, 16 }
  0x4a   :  { %p542_p4 = scmp.ne.s32.totalorder %s828_s2, %s541_s12  ;;  %p545_p5 = scmp.lt.u32.totalorder %s541_s12, %s828_s2 }
  0x4c   :  { %p547_p6 = pnand %p545_p5, %p542_p4 }
  0x4e   :  { %550 = shalt.err (!%p547_p6)
}
  0x4f   :  { %s551_s0 = scalar_lea.vmem %s46_s29, 16  ;;  %s555_s8 = scalar_lea.vmem %s46_s29, 32 }
  0x50   :  { %p552_p7 = scmp.ne.s32.totalorder %s46_s29, %s551_s0  ;;  %p556_p8 = scmp.lt.s32.totalorder %s46_s29, %s46_s29 }
  0x51   :  { %p557_p9 = scmp.lt.s32.totalorder %s555_s8, %s551_s0 }
  0x53   :  { %p558_p10 = por %p557_p9, %p556_p8 }
  0x55   :  { %p559_p11 = pnand %p558_p10, %p552_p7 }
  0x57   :  { %562 = shalt.err (!%p559_p11)
}
  0x58   :  { %48 = dma.hbm_to_vmem [thread:$0]  %s828_s2, 16, %s46_s29, [#allocation6]  }
  0x59   :  { %s563_s19 = scalar_lea.hbm %s830_s4, 16 }
  0x5a   :  { %p564_p12 = scmp.ne.s32.totalorder %s830_s4, %s563_s19  ;;  %p567_p13 = scmp.lt.u32.totalorder %s563_s19, %s830_s4 }
  0x5c   :  { %p569_p0 = pnand %p567_p13, %p564_p12 }
  0x5e   :  { %572 = shalt.err (!%p569_p0)
}
  0x5f   :  { %s573_s25 = scalar_lea.vmem %s68_s9, 16  ;;  %s577_s24 = scalar_lea.vmem %s68_s9, 32 }
  0x60   :  { %p574_p1 = scmp.ne.s32.totalorder %s68_s9, %s573_s25  ;;  %p578_p2 = scmp.lt.s32.totalorder %s68_s9, %s68_s9 }
  0x61   :  { %p579_p3 = scmp.lt.s32.totalorder %s577_s24, %s573_s25 }
  0x63   :  { %p580_p4 = por %p579_p3, %p578_p2 }
  0x65   :  { %p581_p5 = pnand %p580_p4, %p574_p1 }
  0x67   :  { %584 = shalt.err (!%p581_p5)
}
  0x68   :  { %70 = dma.hbm_to_vmem [thread:$0]  %s830_s4, 16, %s68_s9, [#allocation9]  }
  0x69   :  { %s649_s28 = smov [#allocation13]   ;;  %s585_s11 = scalar_lea.hbm %s832_s6, 16 }
  0x6a   :  { %s89_s29 = sshll.u32 %s649_s28, 4  ;;  %p586_p6 = scmp.ne.s32.totalorder %s832_s6, %s585_s11  ;;  %s90_s29 = int_to_ptr.vmem [resolvable:$true] %s89_s29 }
  0x6b   :  { %p589_p7 = scmp.lt.u32.totalorder %s585_s11, %s832_s6 }
  0x6d   :  { %p591_p8 = pnand %p589_p7, %p586_p6 }
  0x6f   :  { %594 = shalt.err (!%p591_p8)
}
  0x70   :  { %s595_s3 = scalar_lea.vmem %s90_s29, 16  ;;  %s599_s4 = scalar_lea.vmem %s90_s29, 32 }
  0x71   :  { %p596_p9 = scmp.ne.s32.totalorder %s90_s29, %s595_s3  ;;  %p600_p10 = scmp.lt.s32.totalorder %s90_s29, %s90_s29 }
  0x72   :  { %p601_p11 = scmp.lt.s32.totalorder %s599_s4, %s595_s3 }
  0x74   :  { %p602_p12 = por %p601_p11, %p600_p10 }
  0x76   :  { %p603_p13 = pnand %p602_p12, %p596_p9 }
  0x78   :  { %606 = shalt.err (!%p603_p13)
}
  0x79   :  { %92 = dma.hbm_to_vmem [thread:$0]  %s832_s6, 16, %s90_s29, [#allocation12]  }
  0x7a   :  { %629 = dma.done.wait [#allocation3], 256  }
  0x7b   :  { %630 = vsyncadd [#allocation3], 4294967040 }
  0x7c   :  { %631 = dma.done.wait [#allocation6], 32  }
  0x7d   :  { %632 = vsyncadd [#allocation6], 4294967264 }
  0x7e   :  { %633 = dma.done.wait [#allocation9], 272  }
  0x7f   :  { %634 = vsyncadd [#allocation9], 4294967024 }
  0x80   :  { %635 = dma.done.wait [#allocation12], 1040  }
  0x81   :  { %636 = vsyncadd [#allocation12], 4294966256  ;;  %vm119_vm0 = vcmask 261120   ;;  %v794_v0 = vld [vmem:[#allocation2] sm:$0xff]  ;;  %v796_v1 = vld [vmem:[#allocation2 + $0x8] sm:$0xff]  ;;  %v650_v15 = vmov 0.0  }
  0x82   :  { %v120_v2 = vsel %vm119_vm0, %v794_v0, 0.0  ;;  %v123_v3 = vsel %vm119_vm0, %v796_v1, 0.0  ;;  %v439_v14 = vld [vmem:[#allocation8] sm:$0xff]   ;;  %397 = vmatprep.subr.bf16.mxu0 %v650_v15  ;;  %405 = vmatprep.subr.bf16.mxu1 %v650_v15  ;;  %v440_v16 = vld [vmem:[#allocation8 + $0x8] sm:$0xff]   ;;  %vm651_vm1 = vmmov 0   ;;  %v441_v17 = vld [vmem:[#allocation11] sm:$0xff]  }
  0x83   :  { %121 = vadd.xlane.f32.xlu0 %v120_v2  ;;  %398 = vmatpush3.bf16.msra.mxu0 %v439_v14  ;;  %v442_v18 = vld [vmem:[#allocation11 + $0x8] sm:$0xff]   ;;  %v443_v19 = vld [vmem:[#allocation11 + $0x10] sm:$0xff]   ;;  %v444_v20 = vld [vmem:[#allocation11 + $0x18] sm:$0xff]   ;;  %s652_s6 = smov [#allocation14]  }
  0x84   :  { %401 = vmatprep.mubr.msk.bf16.mxu0 %vm651_vm1, %v650_v15  ;;  %399 = vmatprep.subr.bf16.mxu0 %v650_v15  ;;  %v445_v21 = vld [vmem:[#allocation11 + $0x20] sm:$0xff]   ;;  %v446_v22 = vld [vmem:[#allocation11 + $0x28] sm:$0xff]   ;;  %v447_v40 = vld [vmem:[#allocation11 + $0x30] sm:$0xff]   ;;  %s355_s8 = sshll.u32 %s652_s6, 4  ;;  %s356_s8 = int_to_ptr.vmem [resolvable:$true] %s355_s8 }
  0x85   :  { %421 = vmatprep.mubr.msk.bf16.mxu1 %vm651_vm1, %v650_v15  ;;  %406 = vmatpush3.bf16.msra.mxu1 %v441_v17  ;;  %v370_v31 = vld [vmem:[#allocation5] ss:$0 sm:$0xff]  ;;  %v371_v35 = vld [vmem:[#allocation7] ss:$0 sm:$0xff]  ;;  %v448_v41 = vld [vmem:[#allocation11 + $0x38] sm:$0xff]   ;;  %s607_s27 = scalar_lea.vmem %s356_s8, 256  ;;  %p612_p1 = scmp.lt.s32.totalorder %s356_s8, %s356_s8 }
  0x86   :  { %407 = vmatprep.subr.bf16.mxu1 %v650_v15  ;;  %v372_v42 = vld [vmem:[#allocation10] ss:$0 sm:$0xff]  ;;  %v376_v52 = vld [vmem:[#allocation13] ss:$0 sm:$0xff]  ;;  %p608_p0 = scmp.ne.s32.totalorder %s356_s8, %s607_s27  ;;  %p613_p2 = scmp.lt.s32.totalorder %s607_s27, %s607_s27 }
  0x87   :  { %124 = vadd.xlane.f32.xlu0 %v123_v3  ;;  %400 = vmatpush3.bf16.msra.mxu0 %v440_v16 }
  0x88   :  { %p614_p3 = por %p613_p2, %p612_p1 }
  0x89   :  { %408 = vmatpush3.bf16.msra.mxu1 %v442_v18 }
  0x8a   :  { %409 = vmatprep.subr.bf16.mxu1 %v650_v15  ;;  %p615_p4 = pnand %p614_p3, %p608_p0 }
  0x8d   :  { %410 = vmatpush3.bf16.msra.mxu1 %v443_v19 }
  0x8e   :  { %411 = vmatprep.subr.bf16.mxu1 %v650_v15 }
  0x91   :  { %412 = vmatpush3.bf16.msra.mxu1 %v444_v20 }
  0x92   :  { %413 = vmatprep.subr.bf16.mxu1 %v650_v15 }
  0x95   :  { %414 = vmatpush3.bf16.msra.mxu1 %v445_v21 }
  0x96   :  { %415 = vmatprep.subr.bf16.mxu1 %v650_v15 }
  0x99   :  { %416 = vmatpush3.bf16.msra.mxu1 %v446_v22 }
  0x9a   :  { %417 = vmatprep.subr.bf16.mxu1 %v650_v15 }
  0x9d   :  { %418 = vmatpush3.bf16.msra.mxu1 %v447_v40 }
  0x9e   :  { %419 = vmatprep.subr.bf16.mxu1 %v650_v15 }
  0xa1   :  { %420 = vmatpush3.bf16.msra.mxu1 %v448_v41 }
 0x110   :  { %v122_v4 = vpop.xlane.xlu0 %121 }
 0x111   :  { %v127_v5 = vmul.f32 0.03125, %v122_v4 }
 0x113   :  { %v129_v6 = vsub.f32 %v794_v0, %v127_v5 }
 0x114   :  { %v125_v7 = vpop.xlane.xlu0 %124 }
 0x115   :  { %v128_v8 = vmul.f32 0.03125, %v125_v7  ;;  %v131_v9 = vmul.f32 %v129_v6, %v129_v6 }
 0x117   :  { %v130_v10 = vsub.f32 %v796_v1, %v128_v8  ;;  %v133_v11 = vsel %vm119_vm0, %v131_v9, 0.0 }
 0x118   :  { %134 = vadd.xlane.f32.xlu1 %v133_v11 }
 0x119   :  { %v132_v12 = vmul.f32 %v130_v10, %v130_v10 }
 0x11b   :  { %v136_v13 = vsel %vm119_vm0, %v132_v12, 0.0 }
 0x11c   :  { %137 = vadd.xlane.f32.xlu1 %v136_v13 }
 0x1a5   :  { %v135_v23 = vpop.xlane.xlu1 %134 }
 0x1a6   :  { %v139_v24 = vmul.f32 0.03125, %v135_v23 }
 0x1a8   :  { %v141_v25 = vadd.f32 1e-05, %v139_v24 }
 0x1a9   :  { %v138_v26 = vpop.xlane.xlu1 %137 }
 0x1aa   :  { %449 = vrsqrt.f32 %v141_v25  ;;  %v140_v27 = vmul.f32 0.03125, %v138_v26 }
 0x1ac   :  { %v142_v28 = vadd.f32 1e-05, %v140_v27 }
 0x1ae   :  { %451 = vrsqrt.f32 %v142_v28 }
 0x1b4   :  { %v450_v29 = vpop.eup %449 }
 0x1b5   :  { %v145_v30 = vmul.f32 %v450_v29, %v129_v6 }
 0x1b7   :  { %v153_v34 = vmul.f32 %v370_v31, %v145_v30 }
 0x1b8   :  { %v452_v32 = vpop.eup %451 }
 0x1b9   :  { %v146_v33 = vmul.f32 %v452_v32, %v130_v10  ;;  %v161_v37 = vadd.f32 %v371_v35, %v153_v34 }
 0x1bb   :  { %v154_v36 = vmul.f32 %v370_v31, %v146_v33 }
 0x1bd   :  { %v162_v38 = vadd.f32 %v371_v35, %v154_v36 }
 0x1bf   :  { %v163_v39 = vpack.c.bf16 %v162_v38, %v161_v37 }
 0x1c1   :  { %402 = vmatmul.mubr.msk.bf16.vlgmr.msra.gmra.mrb[0].mxu0 %vm119_vm0, %v163_v39 }
 0x294   :  { %v224_v43 = vpop.f32.mrb[0].mxu0 }
 0x295   :  { %v225_v44 = vadd.f32 %v372_v42, %v224_v43  ;;  %v403_v45 = vpop.f32.mrb[1].mxu0 }
 0x296   :  { %v227_v46 = vpop.f32.mrb[2].mxu0 }
 0x297   :  { %v228_v47 = vadd.f32 %v372_v42, %v227_v46  ;;  %v404_v48 = vpop.f32.mrb[3].mxu0  ;;  %v231_v49 = vmax.f32 %v225_v44, 0.0 }
 0x299   :  { %v232_v50 = vmax.f32 %v228_v47, 0.0 }
 0x29b   :  { %v233_v51 = vpack.c.bf16 %v232_v50, %v231_v49 }
 0x29d   :  { %422 = vmatmul.mubr.bf16.vlgmr.msra.gmra.mrb[0].mxu1 %v233_v51 }
 0x370   :  { %v339_v53 = vpop.f32.mrb[0].mxu1 }
 0x371   :  { %v340_v54 = vadd.f32 %v376_v52, %v339_v53  ;;  %v423_v55 = vpop.f32.mrb[1].mxu1 }
 0x372   :  { %v342_v56 = vpop.f32.mrb[2].mxu1 }
 0x373   :  { %v346_v57 = vadd.f32 %v340_v54, %v794_v0  ;;  %v343_v58 = vadd.f32 %v376_v52, %v342_v56  ;;  %v424_v59 = vpop.f32.mrb[3].mxu1 }
 0x375   :  { %348 = vst.msk [vmem:[#allocation14] sm:$0xff] %vm119_vm0, %v346_v57  ;;  %v347_v60 = vadd.f32 %v343_v58, %v796_v1 }
 0x377   :  { %349 = vst.msk [vmem:[#allocation14 + $0x8] sm:$0xff] %vm119_vm0, %v347_v60 }
 0x378   :  { %618 = shalt.err (!%p615_p4)
}
 0x379   :  { %s619_s18 = scalar_lea.hbm %s833_s7, 256 }
 0x37a   :  { %p620_p5 = scmp.ne.s32.totalorder %s833_s7, %s619_s18  ;;  %p623_p6 = scmp.lt.u32.totalorder %s619_s18, %s833_s7 }
 0x37c   :  { %p625_p7 = pnand %p623_p6, %p620_p5 }
 0x37e   :  { %628 = shalt.err (!%p625_p7)
}
 0x37f   :  { %361 = dma.vmem_to_hbm [thread:$0]  %s356_s8, 256, %s833_s7, [#allocation4], %s645_s5, %s645_s5, %s646_s1  }
 0x380   :  { %637 = dma.done.wait [#allocation4], 256  }
 0x381   :  { %638 = vsyncadd [#allocation4], 4294967040 }
 0x382   :  { %365 = vsyncpa [#allocation3], 1 }
 0x383   :  { %366 = vsyncpa [#allocation6], 1 }
 0x384   :  { %367 = vsyncpa [#allocation9], 1 }
 0x385   :  { %368 = vsyncpa [#allocation12], 1 }
 0x386   :  { %369 = vsyncpa [#allocation4], 1 }

// kernel: encoder_layer_prenorm.2
= control target key start
LH: loop header
LB: loop body
LE: loop exit
PB: predicated region body
PF: predicated region fallthrough
CT: control target
= control target key end

     0   :  { %s2363_s0 = inlined_call_operand.hbm [shape: f32[16,32], index: 0, kind: input, shape index: {}]   ;;  %s2364_s1 = inlined_call_operand.hbm [shape: f32[1,32], index: 1, kind: input, shape index: {}]   ;;  %s2365_s2 = inlined_call_operand.hbm [shape: f32[1,32], index: 2, kind: input, shape index: {}]   ;;  %s2366_s3 = inlined_call_operand.hbm [shape: bf16[32,96], index: 3, kind: input, shape index: {}]   ;;  %s2367_s4 = inlined_call_operand.hbm [shape: f32[1,96], index: 4, kind: input, shape index: {}]   ;;  %s2368_s5 = inlined_call_operand.hbm [shape: bf16[32,32], index: 5, kind: input, shape index: {}]   ;;  %s2369_s6 = inlined_call_operand.hbm [shape: f32[1,32], index: 6, kind: input, shape index: {}]   ;;  %s2370_s7 = inlined_call_operand.hbm [shape: f32[16,32], index: 7, kind: output, shape index: {0}]   ;;  %s2371_s8 = inlined_call_operand.hbm [shape: f32[2,4,8,8], index: 8, kind: output, shape index: {1}]  }
   0x1   :  { %2375 = sst [smem:[#allocation23_spill]] %s2364_s1 }
   0x2   :  { %14 = vsyncpa [#allocation3], 0 }
   0x3   :  { %16 = vsyncpa [#allocation3 + $0x1], 0 }
   0x4   :  { %17 = vsyncpa [#allocation6], 0 }
   0x5   :  { %18 = vsyncpa [#allocation9], 0 }
   0x6   :  { %19 = vsyncpa [#allocation12], 0 }
   0x7   :  { %20 = vsyncpa [#allocation4], 0 }
   0x8   :  { %22 = vsyncpa [#allocation4 + $0x1], 0 }
   0x9   :  { %23 = vsyncpa [#allocation16], 0 }
   0xa   :  { %25 = vsyncpa [#allocation16 + $0x1], 0  ;;  %s1915_s27 = smov 0   ;;  %s1917_s28 = smov 0  }
   0xb   :  { %s1919_s29 = smov 0   ;;  %s1921_s30 = smov 0  }
   0xc LB: > { %s1842_s9 = smov [#allocation5]   ;;  %s1936_s11 = sadd.s32 4294967295, %s1840_s30   ;;  %s1840_s30 = sphi %s1921_s30, %s2399_s30   ;;  %s1836_s29 = sphi %s1919_s29, %s2398_s29   ;;  %s1832_s28 = sphi %s1917_s28, %s2397_s28   ;;  %s1828_s27 = sphi %s1915_s27, %s2396_s27  }
   0xd   : > { %s253_s10 = sshll.u32 %s1842_s9, 4  ;;  %p1244_p0 = scmp.ge.s32.totalorder %s1840_s30, 1  ;;  %s1941_s10 = int_to_ptr.vmem [resolvable:$true] %s253_s10 }
   0xe   : > { %p2372_p1 = scmp.eq.s32.totalorder %s1936_s11, 0  ;;  %p240_p2 = scmp.lt.s32.totalorder %s1840_s30, 3 }
   0xf   : > { %s1843_s13 = smov [#allocation8]   ;;  %s1844_s16 = smov [#allocation11]  }
  0x10   : > { %p1943_p3 = pnand %p1244_p0, %p240_p2  ;;  %s274_s14 = sshll.u32 %s1843_s13, 4  ;;  %s1950_s14 = int_to_ptr.vmem [resolvable:$true] %s274_s14 }
  0x11   : > { %s298_s17 = sshll.u32 %s1844_s16, 4  ;;  %s2378_s1 = sld [smem:[#allocation23_spill]]  ;;  %s1958_s17 = int_to_ptr.vmem [resolvable:$true] %s298_s17 }
  0x12   : > { %s2376_s12 = scalar_select %p1943_p3, 1, 0 }
  0x13   : > { %p1409_p5 = pneg %p1943_p3 }
  0x15   : > { %p1954_p6 = pnand %p1409_p5, %p2372_p1 }
  0x17   : > { %s1532_s20 = scalar_lea.hbm %s2378_s1, 16  ;;  %p1968_p8 = pneg %p1954_p6 }
  0x18   : > { %p1533_p7 = scmp.ne.s32.totalorder %s2378_s1, %s1532_s20  ;;  %p1539_p11 = scmp.lt.u32.totalorder %s1532_s20, %s2378_s1 }
  0x1a   : > { %p1535_p9 = pnand %p1968_p8, %p1533_p7 }
  0x1c   : > { %p1536_p10 = pneg %p1535_p9 }
  0x1e   : > { %p1541_p12 = pnand %p1539_p11, %p1536_p10 }
  0x20   : > { %1544 = shalt.err (!%p1541_p12)
}
  0x21   : > { %s1545_s26 = scalar_lea.vmem %s1941_s10, 16  ;;  %s1552_s9 = scalar_lea.vmem %s1941_s10, 32 }
  0x22   : > { %p1546_p13 = scmp.ne.s32.totalorder %s1941_s10, %s1545_s26  ;;  %p1553_p5 = scmp.lt.s32.totalorder %s1941_s10, %s1941_s10 }
  0x23   : > { %p1554_p7 = scmp.lt.s32.totalorder %s1552_s9, %s1545_s26 }
  0x24   : > { %p1548_p0 = pnand %p1546_p13, %p1968_p8 }
  0x25   : > { %p1555_p9 = por %p1554_p7, %p1553_p5 }
  0x26   : > { %p1549_p2 = pneg %p1548_p0 }
  0x28   : > { %p1556_p4 = pnand %p1555_p9, %p1549_p2 }
  0x2a   : > { %1559 = shalt.err (!%p1556_p4)
}
  0x2b   : > { %1412 = dma.hbm_to_vmem [thread:$0]  (!%p1954_p6), %s2378_s1, 16, %s1941_s10, [#allocation6]  }
  0x2c   : > { %s1560_s20 = scalar_lea.hbm %s2366_s3, 256 }
  0x2d   : > { %p1561_p10 = scmp.ne.s32.totalorder %s2366_s3, %s1560_s20  ;;  %p1567_p4 = scmp.lt.u32.totalorder %s1560_s20, %s2366_s3 }
  0x2f   : > { %p1563_p11 = pnand %p1561_p10, %p1968_p8 }
  0x31   : > { %p1564_p12 = pneg %p1563_p11 }
  0x33   : > { %p1569_p13 = pnand %p1567_p4, %p1564_p12 }
  0x35   : > { %1572 = shalt.err (!%p1569_p13)
}
  0x36   : > { %s1573_s10 = scalar_lea.vmem %s1950_s14, 256  ;;  %p1581_p7 = scmp.lt.s32.totalorder %s1950_s14, %s1950_s14 }
  0x37   : > { %p1574_p0 = scmp.ne.s32.totalorder %s1950_s14, %s1573_s10  ;;  %p1582_p9 = scmp.lt.s32.totalorder %s1573_s10, %s1573_s10 }
  0x39   : > { %p1576_p2 = pnand %p1574_p0, %p1968_p8  ;;  %p1583_p10 = por %p1582_p9, %p1581_p7 }
  0x3b   : > { %p1577_p5 = pneg %p1576_p2 }
  0x3d   : > { %p1584_p11 = pnand %p1583_p10, %p1577_p5 }
  0x3f   : > { %1587 = shalt.err (!%p1584_p11)
}
  0x40   : > { %s1845_s26 = smov 64   ;;  %s1846_s9 = smov 4  }
  0x41   : > { %1418 = dma.hbm_to_vmem [thread:$0]  (!%p1954_p6), %s2366_s3, 256, %s1950_s14, [#allocation9], %s1845_s26, %s1845_s26, %s1846_s9  }
  0x42   : > { %s1588_s20 = scalar_lea.hbm %s2368_s5, 256 }
  0x43   : > { %p1589_p12 = scmp.ne.s32.totalorder %s2368_s5, %s1588_s20  ;;  %p1595_p0 = scmp.lt.u32.totalorder %s1588_s20, %s2368_s5 }
  0x45   : > { %p1591_p4 = pnand %p1589_p12, %p1968_p8 }
  0x47   : > { %p1592_p13 = pneg %p1591_p4 }
  0x49   : > { %p1597_p2 = pnand %p1595_p0, %p1592_p13 }
  0x4b   : > { %1600 = shalt.err (!%p1597_p2)
}
  0x4c   : > { %s1601_s14 = scalar_lea.vmem %s1958_s17, 256  ;;  %p1609_p10 = scmp.lt.s32.totalorder %s1958_s17, %s1958_s17 }
  0x4d   : > { %p1602_p5 = scmp.ne.s32.totalorder %s1958_s17, %s1601_s14  ;;  %p1610_p11 = scmp.lt.s32.totalorder %s1601_s14, %s1601_s14 }
  0x4f   : > { %p1604_p7 = pnand %p1602_p5, %p1968_p8  ;;  %p1611_p12 = por %p1610_p11, %p1609_p10 }
  0x51   : > { %p1605_p9 = pneg %p1604_p7 }
  0x53   : > { %p1612_p4 = pnand %p1611_p12, %p1605_p9 }
  0x55   : > { %1615 = shalt.err (!%p1612_p4)
}
  0x56   : > { %1424 = dma.hbm_to_vmem [thread:$0]  (!%p1954_p6), %s2368_s5, 256, %s1958_s17, [#allocation12], %s1845_s26, %s1845_s26, %s1846_s9  }
  0x57   : > { %s1847_s16 = smov [#allocation7]   ;;  %s1848_s19 = smov [#allocation10]  }
  0x58   : > { %s264_s18 = sshll.u32 %s1847_s16, 4  ;;  %s288_s20 = sshll.u32 %s1848_s19, 4  ;;  %s265_s18 = int_to_ptr.vmem [resolvable:$true] %s264_s18  ;;  %s289_s20 = int_to_ptr.vmem [resolvable:$true] %s288_s20 }
  0x59   : > { %s1616_s24 = scalar_lea.hbm %s2365_s2, 16 }
  0x5a   : > { %p1617_p13 = scmp.ne.s32.totalorder %s2365_s2, %s1616_s24  ;;  %p1623_p5 = scmp.lt.u32.totalorder %s1616_s24, %s2365_s2 }
  0x5c   : > { %p1619_p0 = pnand %p1617_p13, %p1968_p8 }
  0x5e   : > { %p1620_p2 = pneg %p1619_p0 }
  0x60   : > { %p1625_p7 = pnand %p1623_p5, %p1620_p2 }
  0x62   : > { %1628 = shalt.err (!%p1625_p7)
}
  0x63   : > { %s1629_s17 = scalar_lea.vmem %s265_s18, 16  ;;  %s1636_s26 = scalar_lea.vmem %s265_s18, 32 }
  0x64   : > { %p1630_p9 = scmp.ne.s32.totalorder %s265_s18, %s1629_s17  ;;  %p1637_p12 = scmp.lt.s32.totalorder %s265_s18, %s265_s18 }
  0x65   : > { %p1638_p4 = scmp.lt.s32.totalorder %s1636_s26, %s1629_s17 }
  0x66   : > { %p1632_p10 = pnand %p1630_p9, %p1968_p8 }
  0x67   : > { %p1639_p1 = por %p1638_p4, %p1637_p12 }
  0x68   : > { %p1633_p11 = pneg %p1632_p10 }
  0x6a   : > { %p1640_p3 = pnand %p1639_p1, %p1633_p11 }
  0x6c   : > { %1643 = shalt.err (!%p1640_p3)
}
  0x6d   : > { %1415 = dma.hbm_to_vmem [thread:$0]  (!%p1954_p6), %s2365_s2, 16, %s265_s18, [#allocation6]  }
  0x6e   : > { %s1644_s19 = scalar_lea.hbm %s2367_s4, 16 }
  0x6f   : > { %p1645_p13 = scmp.ne.s32.totalorder %s2367_s4, %s1644_s19  ;;  %p1651_p3 = scmp.lt.u32.totalorder %s1644_s19, %s2367_s4 }
  0x71   : > { %p1647_p0 = pnand %p1645_p13, %p1968_p8 }
  0x73   : > { %p1648_p1 = pneg %p1647_p0 }
  0x75   : > { %p1653_p2 = pnand %p1651_p3, %p1648_p1 }
  0x77   : > { %1656 = shalt.err (!%p1653_p2)
}
  0x78   : > { %s1657_s14 = scalar_lea.vmem %s289_s20, 16  ;;  %s1664_s18 = scalar_lea.vmem %s289_s20, 32 }
  0x79   : > { %p1658_p5 = scmp.ne.s32.totalorder %s289_s20, %s1657_s14  ;;  %p1665_p10 = scmp.lt.s32.totalorder %s289_s20, %s289_s20 }
  0x7a   : > { %p1666_p11 = scmp.lt.s32.totalorder %s1664_s18, %s1657_s14 }
  0x7b   : > { %p1660_p7 = pnand %p1658_p5, %p1968_p8 }
  0x7c   : > { %p1667_p12 = por %p1666_p11, %p1665_p10 }
  0x7d   : > { %p1661_p9 = pneg %p1660_p7 }
  0x7f   : > { %p1668_p4 = pnand %p1667_p12, %p1661_p9 }
  0x81   : > { %1671 = shalt.err (!%p1668_p4)
}
  0x82   : > { %1421 = dma.hbm_to_vmem [thread:$0]  (!%p1954_p6), %s2367_s4, 16, %s289_s20, [#allocation9]  }
  0x83   : > { %s1849_s26 = smov [#allocation13]   ;;  %s1672_s16 = scalar_lea.hbm %s2369_s6, 16 }
  0x84   : > { %s312_s9 = sshll.u32 %s1849_s26, 4  ;;  %p1673_p13 = scmp.ne.s32.totalorder %s2369_s6, %s1672_s16  ;;  %s313_s9 = int_to_ptr.vmem [resolvable:$true] %s312_s9 }
  0x85   : > { %p1679_p3 = scmp.lt.u32.totalorder %s1672_s16, %s2369_s6 }
  0x86   : > { %p1675_p0 = pnand %p1673_p13, %p1968_p8 }
  0x88   : > { %p1676_p1 = pneg %p1675_p0 }
  0x8a   : > { %p1681_p2 = pnand %p1679_p3, %p1676_p1 }
  0x8c   : > { %1684 = shalt.err (!%p1681_p2)
}
  0x8d   : > { %s1685_s20 = scalar_lea.vmem %s313_s9, 16  ;;  %s1692_s25 = scalar_lea.vmem %s313_s9, 32 }
  0x8e   : > { %p1686_p5 = scmp.ne.s32.totalorder %s313_s9, %s1685_s20  ;;  %p1693_p10 = scmp.lt.s32.totalorder %s313_s9, %s313_s9 }
  0x8f   : > { %p1694_p11 = scmp.lt.s32.totalorder %s1692_s25, %s1685_s20 }
  0x90   : > { %p1688_p7 = pnand %p1686_p5, %p1968_p8 }
  0x91   : > { %p1695_p12 = por %p1694_p11, %p1693_p10 }
  0x92   : > { %p1689_p9 = pneg %p1688_p7 }
  0x94   : > { %p1696_p4 = pnand %p1695_p12, %p1689_p9 }
  0x96   : > { %1699 = shalt.err (!%p1696_p4)
}
  0x97   : > { %1427 = dma.hbm_to_vmem [thread:$0]  (!%p1954_p6), %s2369_s6, 16, %s313_s9, [#allocation12]  }
  0x98   : > { %s1243_s23 = sadd.s32 4294967294, %s1840_s30   ;;  %s2092_s15 = sadd.s32 1, %s1840_s30  }
  0x99   : > { %s35_s10 = ssub.s32 %s1840_s30, %s2092_s15  ;;  %s38_s17 = sadd.s32 1, %s1836_s29 }
  0x9a   : > { %p36_p8 = scmp.eq.s32.totalorder %s35_s10, 0  ;;  %p45_p13 = scmp.ne.s32.totalorder %s1836_s29, %s1832_s28 }
  0x9b   : > { %p46_p0 = scmp.eq.s32.totalorder %s1840_s30, 0  ;;  %p51_p1 = scmp.ne.s32.totalorder %s1832_s28, %s1828_s27 }
  0x9c   : > { %s2103_s26 = scalar_select %p36_p8, %s1836_s29, %s38_s17  }
  0x9d   : > { %p2105_p3 = por %p46_p0, %p45_p13  ;;  %p2381_p2 = scmp.eq.s32.totalorder %s1936_s11, 0 }
  0x9e   : > { %p201_p5 = scmp.eq.s32.totalorder %s1936_s11, 1  ;;  %p207_p7 = scmp.eq.s32.totalorder %s1243_s23, 1 }
  0x9f   : > { %p2111_p6 = por %p2381_p2, %p51_p1  ;;  %p1445_p9 = scmp.lt.s32.totalorder %s1840_s30, 2 }
  0xa0   : > { %s323_s1 = sand.u32 1, %s1836_s29   ;;  %p2118_p10 = por %p201_p5, %p45_p13 }
  0xa1   : > { %p2122_p11 = por %p207_p7, %p51_p1  ;;  %s1252_s21 = sshll.u32 %s323_s1, 3 }
  0xa2   : > { %s2383_s16 = scalar_select %p2118_p10, 1, 0 }
  0xa3   : > { %s2384_s19 = scalar_select %p2122_p11, 1, 0 }
  0xa4   : > { %s1253_s22 = sshll.u32 %s1840_s30, 7  ;;  %s327_s14 = scalar_lea.vmem [#allocation2], %s1252_s21 }
  0xa5   : > { %s2130_s25 = scalar_lea.hbm %s2363_s0, %s1253_s22  ;;  %s334_s18 = sshll.u32 %s327_s14, 4  ;;  %s2132_s18 = int_to_ptr.vmem [resolvable:$true] %s334_s18 }
  0xa6   : > { %p2136_p12 = pnand %p1445_p9, %p2105_p3  ;;  %s324_s10 = scalar_lea.sflag [#allocation3], %s323_s1 }
  0xa7   : > { %s1700_s17 = scalar_lea.hbm %s2130_s25, 128  ;;  %s1705_s24 = scalar_lea.hbm %s2363_s0, 256 }
  0xa8   : > { %p1701_p4 = scmp.ne.s32.totalorder %s2130_s25, %s1700_s17  ;;  %p1702_p8 = pneg %p2136_p12 }
  0xa9   : > { %p1706_p1 = scmp.lt.u32.totalorder %s2130_s25, %s2363_s0  ;;  %p1707_p3 = scmp.lt.u32.totalorder %s1705_s24, %s1700_s17 }
  0xaa   : > { %p1703_p13 = pnand %p1702_p8, %p1701_p4  ;;  %p1709_p5 = scmp.lt.u32.totalorder %s1700_s17, %s2130_s25 }
  0xab   : > { %p1708_p2 = por %p1707_p3, %p1706_p1 }
  0xac   : > { %p1704_p0 = pneg %p1703_p13 }
  0xad   : > { %p1710_p7 = por %p1709_p5, %p1708_p2 }
  0xaf   : > { %p1711_p9 = pnand %p1710_p7, %p1704_p0 }
  0xb1   : > { %1714 = shalt.err (!%p1711_p9)
}
  0xb2   : > { %s1715_s1 = scalar_lea.vmem %s2132_s18, 128  ;;  %s1850_s14 = smov [#allocation2]  }
  0xb3   : > { %p1716_p4 = scmp.ne.s32.totalorder %s2132_s18, %s1715_s1  ;;  %s1720_s21 = sshll.u32 %s1850_s14, 4  ;;  %s1721_s21 = int_to_ptr.vmem [resolvable:$false] %s1720_s21 }
  0xb4   : > { %s1722_s22 = scalar_lea.vmem %s1721_s21, 256  ;;  %p1723_p10 = scmp.lt.s32.totalorder %s2132_s18, %s1721_s21 }
  0xb5   : > { %p1718_p13 = pnand %p1716_p4, %p1702_p8  ;;  %p1724_p1 = scmp.lt.s32.totalorder %s1722_s22, %s1715_s1 }
  0xb7   : > { %p1719_p11 = pneg %p1718_p13  ;;  %p1725_p3 = por %p1724_p1, %p1723_p10 }
  0xb9   : > { %p1726_p2 = pnand %p1725_p3, %p1719_p11 }
  0xbb   : > { %1729 = shalt.err (!%p1726_p2)
}
  0xbc   : > { %1431 = dma.hbm_to_vmem [thread:$0]  (!%p2136_p12), %s2130_s25, 128, %s2132_s18, %s324_s10  }
  0xbd   : > { %p2386_p0 = scmp.ne.s32.totalorder %s2376_s12, 0 }
  0xbe   : > { %s2168_s17 = sand.u32 (!%p2386_p0), 1, %s1832_s28  }
  0xbf   : > { %343 = sbr.rel (%p2386_p0) target bundleno = 2013 (0x7dd), region = 48  ;;  %s1255_s24 = sshll.u32 (!%p2386_p0), %s2168_s17, 3 }
  0xc0   : > { %s346_s13 = scalar_lea.sflag (!%p2386_p0), [#allocation3], %s2168_s17  ;;  %s349_s20 = scalar_lea.vmem (!%p2386_p0), [#allocation2], %s1255_s24 }
  0xc6   : > { %1803 = dma.done.wait (%p2111_p6), %s346_s13, 128  }
  0xc7   : > { %1805 = vsyncadd (%p2111_p6), %s346_s13, 4294967168  ;;  %p2387_p10 = scmp.eq.s32.totalorder %s1936_s11, 0 }
  0xc9   : > { %1807 = dma.done.wait (%p2387_p10), [#allocation6], 32   ;;  %p2388_p11 = pmov %p2387_p10 }
  0xca   : > { %p2389_p12 = pmov %p2387_p10 }
  0xcb   : > { %1809 = vsyncadd (%p2388_p11), [#allocation6], 4294967264 }
  0xcc   : > { %1811 = dma.done.wait (%p2389_p12), [#allocation9], 272   ;;  %p2390_p8 = pmov %p2387_p10 }
  0xce   : > { %1813 = vsyncadd (%p2390_p8), [#allocation9], 4294967024  ;;  %p2391_p5 = pmov %p2390_p8 }
  0xd0   : > { %1815 = dma.done.wait (%p2391_p5), [#allocation12], 272   ;;  %p2392_p7 = pmov %p2391_p5 }
  0xd1   : > { %vm415_vm0 = vcmask 261120   ;;  %v2190_v0 = vld [vmem:[%s349_s20] sm:$0xff]  ;;  %v1510_v7 = vld [vmem:[#allocation8] sm:$0xff]   ;;  %v1851_v8 = vmov 0.0   ;;  %vm1852_vm1 = vmmov 0   ;;  %s1853_s12 = smov 96  }
  0xd2   : > { %1817 = vsyncadd (%p2392_p7), [#allocation12], 4294967024  ;;  %v416_v1 = vsel %vm415_vm0, %v2190_v0, 0.0  ;;  %1315 = vmatprep.subr.bf16.mxu0 %v1851_v8  ;;  %1319 = vmatprep.mubr.msk.bf16.mxu0 %vm1852_vm1, %v1851_v8  ;;  %v1511_v9 = vld [vmem:[#allocation8 + $0x8] sm:$0xff]   ;;  %v1264_v14 = vld [vmem:[#allocation5] ss:$0 sm:$0xff] }
  0xd3   : > { %417 = vadd.xlane.f32.xlu0 %v416_v1  ;;  %1316 = vmatpush3.bf16.msra.mxu0 %v1510_v7  ;;  %v1265_v16 = vld [vmem:[#allocation7] ss:$0 sm:$0xff]  ;;  %v1266_v20 = vld [vmem:[#allocation10] ss:$0 sm:$0xff]  ;;  %s1854_s9 = smov 120   ;;  %s1855_s25 = smov 88  }
  0xd4   : > { %1323 = vmatprep.subr.bf16.mxu1 %v1851_v8  ;;  %1317 = vmatprep.subr.bf16.mxu0 %v1851_v8  ;;  %s1856_s18 = smov 80   ;;  %s1857_s23 = smov 112   ;;  %vm517_vm2 = vcmask 64512   ;;  %vm582_vm3 = vcmask 1043456   ;;  %vm976_vm4 = vcmask 130048   ;;  %vm978_vm5 = vcmask 195584  }
  0xd5   : > { %1325 = vmatprep.mubr.msk.bf16.mxu1 %vm1852_vm1, %v1851_v8  ;;  %s1858_s10 = smov 72   ;;  %s1859_s1 = smov 104  }
  0xd6   : > { %s1860_s14 = smov 64   ;;  %s1861_s21 = smov 56  }
  0xd7   : > { %1318 = vmatpush3.bf16.msra.mxu0 %v1511_v9  ;;  %s1862_s22 = smov 48   ;;  %s1863_s13 = smov 40  }
  0xd8   : > { %1329 = vmatprep.subr.bf16.mxu0 %v1851_v8  ;;  %s1263_s20 = sshll.u32 %s2168_s17, 5  ;;  %p2393_p9 = scmp.ne.s32.totalorder %s2383_s16, 0 }
 0x160   : > { %v418_v2 = vpop.xlane.xlu0 %417 }
 0x161   : > { %v420_v3 = vmul.f32 0.03125, %v418_v2 }
 0x163   : > { %v421_v4 = vsub.f32 %v2190_v0, %v420_v3 }
 0x165   : > { %v422_v5 = vmul.f32 %v421_v4, %v421_v4 }
 0x167   : > { %v423_v6 = vsel %vm415_vm0, %v422_v5, 0.0 }
 0x168   : > { %424 = vadd.xlane.f32.xlu0 %v423_v6 }
 0x1f5   : > { %v425_v10 = vpop.xlane.xlu0 %424 }
 0x1f6   : > { %v426_v11 = vmul.f32 0.03125, %v425_v10 }
 0x1f8   : > { %v427_v12 = vadd.f32 1e-05, %v426_v11 }
 0x1fa   : > { %1514 = vrsqrt.f32 %v427_v12 }
 0x204   : > { %v1515_v13 = vpop.eup %1514 }
 0x205   : > { %v429_v15 = vmul.f32 %v1515_v13, %v421_v4 }
 0x207   : > { %v436_v17 = vmul.f32 %v1264_v14, %v429_v15 }
 0x209   : > { %v443_v18 = vadd.f32 %v1265_v16, %v436_v17 }
 0x20b   : > { %v444_v19 = vpack.c.bf16 %v443_v18, %v443_v18 }
 0x20d   : > { %1320 = vmatmul.mubr.msk.bf16.vlgmr.msra.gmra.mrb[0].mxu0 %vm415_vm0, %v444_v19 }
 0x20e   : > { %1331 = vmatprep.mubr.msk.bf16.mxu0 %vm1852_vm1, %v1851_v8 }
 0x2e0   : > { %v505_v21 = vpop.f32.mrb[0].mxu0 }
 0x2e1   : > { %v506_v22 = vadd.f32 %v1266_v20, %v505_v21  ;;  %v1321_v23 = vpop.f32.mrb[1].mxu0 }
 0x2e2   : > { %v508_v24 = vpop.f32.mrb[2].mxu0 }
 0x2e3   : > { %v511_v25 = vmul.f32 0.35355338, %v506_v22  ;;  %v2207_v26 = vpack.c.bf16 %v506_v22, %v506_v22  ;;  %v1322_v27 = vpop.f32.mrb[3].mxu0 }
 0x2e5   : > { %v512_v28 = vpack.c.bf16 %v511_v25, %v511_v25  ;;  %515 = vrot.lane.b32.xlu1 %v2207_v26, %s1853_s12  ;;  %s2248_s12 = scalar_lea.vmem [#allocation15], %s1263_s20  ;;  %s1867_s20 = smov [#allocation15]  }
 0x2e7   : > { %627 = vrot.lane.b32.xlu0 %v512_v28, %s1854_s9  ;;  %s1864_s9 = smov 8  }
 0x2e9   : > { %629 = vrot.lane.b32.xlu1 %v2207_v26, %s1855_s25  ;;  %s1865_s25 = smov 16  }
 0x2ed   : > { %741 = vrot.lane.b32.xlu1 %v2207_v26, %s1856_s18  ;;  %s1866_s18 = smov 24  }
 0x2f1   : > { %739 = vrot.lane.b32.xlu1 %v512_v28, %s1857_s23  ;;  %s1292_s23 = sshll.u32 %s1936_s11, 9 }
 0x2f5   : > { %853 = vrot.lane.b32.xlu1 %v2207_v26, %s1858_s10  ;;  %s1081_s10 = sshll.u32 %s2248_s12, 4  ;;  %s2284_s10 = int_to_ptr.vmem [resolvable:$true] %s1081_s10 }
 0x2f9   : > { %851 = vrot.lane.b32.xlu1 %v512_v28, %s1859_s1 }
 0x357   : > { %v516_v29 = vpop.permute.xlu1 %515 }
 0x358   : > { %v522_v30 = vsel %vm517_vm2, %v516_v29, 0 }
 0x359   : > { %1324 = vmatpush3.bf16.xpose.msra.mxu1 %v522_v30  ;;  %v628_v34 = vpop.permute.xlu0 %627 }
 0x35a   : > { %1335 = vmatprep.subr.bf16.mxu1 %v1851_v8 }
 0x35b   : > { %v630_v31 = vpop.permute.xlu1 %629 }
 0x35c   : > { %v635_v32 = vsel %vm517_vm2, %v630_v31, 0 }
 0x35f   : > { %v742_v33 = vpop.permute.xlu1 %741 }
 0x360   : > { %1326 = vmatmul.mubr.msk.bf16.vlgmr.msra.gmra.mrb[0].mxu1 %vm517_vm2, %v512_v28  ;;  %v747_v36 = vsel %vm517_vm2, %v742_v33, 0 }
 0x361   : > { %1336 = vmatpush3.bf16.xpose.msra.mxu1 %v635_v32  ;;  %1337 = vmatprep.mubr.msk.bf16.mxu1 %vm1852_vm1, %v1851_v8 }
 0x362   : > { %1347 = vmatprep.subr.bf16.mxu1 %v1851_v8 }
 0x363   : > { %v740_v35 = vpop.permute.xlu1 %739 }
 0x367   : > { %v854_v37 = vpop.permute.xlu1 %853 }
 0x368   : > { %1338 = vmatmul.mubr.msk.bf16.vlgmr.msra.gmra.mrb[4].mxu1 %vm517_vm2, %v628_v34  ;;  %v859_v38 = vsel %vm517_vm2, %v854_v37, 0 }
 0x369   : > { %1348 = vmatpush3.bf16.xpose.msra.mxu1 %v747_v36  ;;  %1349 = vmatprep.mubr.msk.bf16.mxu1 %vm1852_vm1, %v1851_v8 }
 0x36a   : > { %1359 = vmatprep.subr.bf16.mxu1 %v1851_v8 }
 0x36b   : > { %v852_v39 = vpop.permute.xlu1 %851 }
 0x370   : > { %1350 = vmatmul.mubr.msk.bf16.vlgmr.msra.gmra.mrb[8].mxu1 %vm517_vm2, %v740_v35 }
 0x371   : > { %1360 = vmatpush3.bf16.xpose.msra.mxu1 %v859_v38  ;;  %1361 = vmatprep.mubr.msk.bf16.mxu1 %vm1852_vm1, %v1851_v8 }
 0x372   : > { %1371 = vmatprep.subr.bf16.mxu1 %v1851_v8 }
 0x378   : > { %1362 = vmatmul.mubr.msk.bf16.vlgmr.msra.gmra.mrb[12].mxu1 %vm517_vm2, %v852_v39 }
 0x379   : > { %1375 = vmatprep.mubr.msk.bf16.mxu1 %vm1852_vm1, %v1851_v8 }
 0x433   : > { %v558_v40 = vpop.f32.mrb[0].mxu1 }
 0x434   : > { %v1327_v41 = vpop.f32.mrb[1].mxu1  ;;  %v564_v42 = vsel %vm517_vm2, %v558_v40, -inf }
 0x435   : > { %565 = vmax.xlane.f32.xlu1 %v564_v42  ;;  %v561_v43 = vpop.f32.mrb[2].mxu1 }
 0x436   : > { %v1328_v44 = vpop.f32.mrb[3].mxu1 }
 0x43b   : > { %v671_v45 = vpop.f32.mrb[4].mxu1 }
 0x43c   : > { %v1339_v46 = vpop.f32.mrb[5].mxu1  ;;  %v677_v47 = vsel %vm517_vm2, %v671_v45, -inf }
 0x43d   : > { %678 = vmax.xlane.f32.xlu0 %v677_v47  ;;  %v674_v48 = vpop.f32.mrb[6].mxu1 }
 0x43e   : > { %v1340_v49 = vpop.f32.mrb[7].mxu1 }
 0x443   : > { %v783_v50 = vpop.f32.mrb[8].mxu1 }
 0x444   : > { %v1351_v51 = vpop.f32.mrb[9].mxu1  ;;  %v789_v52 = vsel %vm517_vm2, %v783_v50, -inf }
 0x445   : > { %790 = vmax.xlane.f32.xlu1 %v789_v52  ;;  %v786_v53 = vpop.f32.mrb[10].mxu1  ;;  %v1513_v51 = vld [vmem:[#allocation11 + $0x8] sm:$0xff]  }
 0x446   : > { %v1352_v54 = vpop.f32.mrb[11].mxu1 }
 0x44b   : > { %v895_v55 = vpop.f32.mrb[12].mxu1 }
 0x44c   : > { %v1363_v56 = vpop.f32.mrb[13].mxu1  ;;  %v901_v57 = vsel %vm517_vm2, %v895_v55, -inf }
 0x44d   : > { %902 = vmax.xlane.f32.xlu0 %v901_v57  ;;  %v898_v58 = vpop.f32.mrb[14].mxu1 }
 0x44e   : > { %v1364_v59 = vpop.f32.mrb[15].mxu1 }
 0x4c2   : > { %v566_v60 = vpop.xlane.xlu1 %565 }
 0x4c3   : > { %v567_v61 = vsub.f32 %v558_v40, %v566_v60 }
 0x4c5   : > { %v568_v62 = vmul.f32 1.442695, %v567_v61 }
 0x4c7   : > { %1516 = vpow2.f32 %v568_v62 }
 0x4ca   : > { %v679_v63 = vpop.xlane.xlu0 %678 }
 0x4cb   : > { %v680_v1 = vsub.f32 %v671_v45, %v679_v63 }
 0x4cd   : > { %v681_v2 = vmul.f32 1.442695, %v680_v1 }
 0x4cf   : > { %1518 = vpow2.f32 %v681_v2 }
 0x4d1   : > { %v1517_v3 = vpop.eup %1516 }
 0x4d2   : > { %v570_v4 = vsel %vm517_vm2, %v1517_v3, 0.0  ;;  %v791_v13 = vpop.xlane.xlu1 %790 }
 0x4d3   : > { %571 = vadd.xlane.f32.xlu1 %v570_v4  ;;  %v792_v14 = vsub.f32 %v783_v50, %v791_v13  ;;  %v1512_v50 = vld [vmem:[#allocation11] sm:$0xff]  }
 0x4d4   : > { %1372 = vmatpush3.bf16.msra.mxu1 %v1512_v50 }
 0x4d5   : > { %v793_v15 = vmul.f32 1.442695, %v792_v14  ;;  %1373 = vmatprep.subr.bf16.mxu1 %v1851_v8 }
 0x4d8   : > { %1374 = vmatpush3.bf16.msra.mxu1 %v1513_v51 }
 0x4d9   : > { %v1519_v5 = vpop.eup %1518 }
 0x4da   : > { %v903_v6 = vpop.xlane.xlu0 %902  ;;  %v683_v7 = vsel %vm517_vm2, %v1519_v5, 0.0 }
 0x4db   : > { %v904_v9 = vsub.f32 %v895_v55, %v903_v6  ;;  %684 = vadd.xlane.f32.xlu0 %v683_v7 }
 0x4dd   : > { %v905_v10 = vmul.f32 1.442695, %v904_v9 }
 0x4df   : > { %1520 = vpow2.f32 %v905_v10 }
 0x4e0   : > { %1522 = vpow2.f32 %v793_v15 }
 0x4e4   : > { %577 = vrot.lane.b32.xlu1 %v2207_v26, %s1860_s14 }
 0x4e9   : > { %v1521_v11 = vpop.eup %1520 }
 0x4ea   : > { %v907_v12 = vsel %vm517_vm2, %v1521_v11, 0.0  ;;  %v1523_v16 = vpop.eup %1522 }
 0x4eb   : > { %908 = vadd.xlane.f32.xlu0 %v907_v12  ;;  %v795_v17 = vsel %vm517_vm2, %v1523_v16, 0.0 }
 0x501   : > { %691 = vrot.lane.b32.xlu0 %v2207_v26, %s1861_s21  ;;  %s2282_s21 = scalar_lea.hbm %s2371_s8, %s1292_s23 }
 0x508   : > { %796 = vadd.xlane.f32.xlu1 %v795_v17 }
 0x519   : > { %803 = vrot.lane.b32.xlu1 %v2207_v26, %s1862_s22  ;;  %s1055_s22 = scalar_lea.sflag [#allocation16], %s2168_s17 }
 0x51d   : > { %915 = vrot.lane.b32.xlu1 %v2207_v26, %s1863_s13  ;;  %s1730_s13 = scalar_lea.vmem %s2284_s10, 512 }
 0x51e   : > { %p1731_p6 = scmp.ne.s32.totalorder %s2284_s10, %s1730_s13 }
 0x520   : > { %p1732_p4 = pnand %p1731_p6, %p2393_p9 }
 0x522   : > { %p1733_p13 = pneg %p1732_p4 }
 0x560   : > { %v572_v18 = vpop.xlane.xlu1 %571 }
 0x561   : > { %1524 = vrcp.f32 %v572_v18 }
 0x564   : > { %v578_v19 = vpop.permute.xlu1 %577 }
 0x565   : > { %v584_v20 = vsel %vm582_vm3, %v578_v19, 0 }
 0x566   : > { %1330 = vmatpush3.bf16.msra.mxu0 %v584_v20 }
 0x567   : > { %1341 = vmatprep.subr.bf16.mxu0 %v1851_v8 }
 0x568   : > { %v685_v21 = vpop.xlane.xlu0 %684 }
 0x569   : > { %1526 = vrcp.f32 %v685_v21 }
 0x56b   : > { %v1525_v22 = vpop.eup %1524 }
 0x56c   : > { %v574_v23 = vmul.f32 %v1525_v22, %v1517_v3 }
 0x56e   : > { %575 = vst.msk [vmem:[%s2248_s12] sm:$0xff] %vm517_vm2, %v574_v23  ;;  %v576_v24 = vpack.c.bf16 %v574_v23, %v574_v23 }
 0x570   : > { %1332 = vmatmul.mubr.msk.bf16.vlgmr.msra.gmra.mrb[4].mxu0 %vm517_vm2, %v576_v24 }
 0x571   : > { %1343 = vmatprep.mubr.msk.bf16.mxu0 %vm1852_vm1, %v1851_v8 }
 0x573   : > { %v1527_v25 = vpop.eup %1526 }
 0x574   : > { %v687_v26 = vmul.f32 %v1527_v25, %v1519_v5 }
 0x576   : > { %1273 = vst.msk [vmem:[%s2248_s12 + $0x8] sm:$0xff] %vm517_vm2, %v687_v26  ;;  %v690_v30 = vpack.c.bf16 %v687_v26, %v687_v26 }
 0x578   : > { %v909_v27 = vpop.xlane.xlu0 %908 }
 0x579   : > { %1528 = vrcp.f32 %v909_v27 }
 0x57c   : > { %v692_v28 = vpop.permute.xlu0 %691 }
 0x57d   : > { %v697_v29 = vsel %vm582_vm3, %v692_v28, 0 }
 0x57e   : > { %1342 = vmatpush3.bf16.msra.mxu0 %v697_v29 }
 0x57f   : > { %1353 = vmatprep.subr.bf16.mxu0 %v1851_v8 }
 0x581   : > { %1344 = vmatmul.mubr.msk.bf16.vlgmr.msra.gmra.mrb[8].mxu0 %vm517_vm2, %v690_v30 }
 0x582   : > { %1355 = vmatprep.mubr.msk.bf16.mxu0 %vm1852_vm1, %v1851_v8 }
 0x583   : > { %v1529_v31 = vpop.eup %1528 }
 0x584   : > { %v911_v32 = vmul.f32 %v1529_v31, %v1521_v11 }
 0x586   : > { %1279 = vst.msk [vmem:[%s2248_s12 + $0x18] sm:$0xff] %vm517_vm2, %v911_v32  ;;  %v914_v41 = vpack.c.bf16 %v911_v32, %v911_v32 }
 0x595   : > { %v797_v33 = vpop.xlane.xlu1 %796 }
 0x596   : > { %1530 = vrcp.f32 %v797_v33 }
 0x599   : > { %v804_v34 = vpop.permute.xlu1 %803 }
 0x59a   : > { %v809_v35 = vsel %vm582_vm3, %v804_v34, 0 }
 0x59b   : > { %1354 = vmatpush3.bf16.msra.mxu0 %v809_v35 }
 0x59c   : > { %1365 = vmatprep.subr.bf16.mxu0 %v1851_v8 }
 0x59d   : > { %v916_v38 = vpop.permute.xlu1 %915 }
 0x59e   : > { %v921_v40 = vsel %vm582_vm3, %v916_v38, 0 }
 0x5a0   : > { %v1531_v36 = vpop.eup %1530 }
 0x5a1   : > { %v799_v37 = vmul.f32 %v1531_v36, %v1523_v16 }
 0x5a3   : > { %1276 = vst.msk [vmem:[%s2248_s12 + $0x10] sm:$0xff] %vm517_vm2, %v799_v37  ;;  %v802_v39 = vpack.c.bf16 %v799_v37, %v799_v37 }
 0x5a5   : > { %1356 = vmatmul.mubr.msk.bf16.vlgmr.msra.gmra.mrb[12].mxu0 %vm517_vm2, %v802_v39 }
 0x5a6   : > { %1366 = vmatpush3.bf16.msra.mxu0 %v921_v40  ;;  %1367 = vmatprep.mubr.msk.bf16.mxu0 %vm1852_vm1, %v1851_v8 }
 0x5ad   : > { %1368 = vmatmul.mubr.msk.bf16.vlgmr.msra.gmra.mrb[16].mxu0 %vm517_vm2, %v914_v41 }
 0x643   : > { %v620_v42 = vpop.f32.mrb[4].mxu0 }
 0x644   : > { %v1333_v43 = vpop.f32.mrb[5].mxu0 }
 0x645   : > { %v623_v44 = vpop.f32.mrb[6].mxu0 }
 0x646   : > { %v1334_v45 = vpop.f32.mrb[7].mxu0 }
 0x654   : > { %v733_v46 = vpop.f32.mrb[8].mxu0 }
 0x655   : > { %964 = vrot.lane.b32.xlu0 %v733_v46, %s1864_s9  ;;  %v1345_v47 = vpop.f32.mrb[9].mxu0 }
 0x656   : > { %v736_v48 = vpop.f32.mrb[10].mxu0 }
 0x657   : > { %v1346_v49 = vpop.f32.mrb[11].mxu0 }
 0x678   : > { %v845_v52 = vpop.f32.mrb[12].mxu0 }
 0x679   : > { %968 = vrot.lane.b32.xlu1 %v845_v52, %s1865_s25  ;;  %v1357_v53 = vpop.f32.mrb[13].mxu0  ;;  %s1734_s25 = sshll.u32 %s1867_s20, 4  ;;  %s1735_s25 = int_to_ptr.vmem [resolvable:$false] %s1734_s25 }
 0x67a   : > { %v848_v54 = vpop.f32.mrb[14].mxu0  ;;  %s1736_s12 = scalar_lea.vmem %s1735_s25, 1024  ;;  %p1737_p1 = scmp.lt.s32.totalorder %s2284_s10, %s1735_s25 }
 0x67b   : > { %v1358_v55 = vpop.f32.mrb[15].mxu0  ;;  %p1738_p3 = scmp.lt.s32.totalorder %s1736_s12, %s1730_s13 }
 0x67d   : > { %p1739_p2 = por %p1738_p3, %p1737_p1 }
 0x67f   : > { %p1740_p0 = pnand %p1739_p2, %p1733_p13 }
 0x680   : > { %v957_v56 = vpop.f32.mrb[16].mxu0 }
 0x681   : > { %972 = vrot.lane.b32.xlu0 %v957_v56, %s1866_s18  ;;  %v1369_v57 = vpop.f32.mrb[17].mxu0 }
 0x682   : > { %v960_v58 = vpop.f32.mrb[18].mxu0 }
 0x683   : > { %v1370_v59 = vpop.f32.mrb[19].mxu0 }
 0x6c7   : > { %v965_v60 = vpop.permute.xlu0 %964 }
 0x6c8   : > { %v975_v61 = vsel %vm517_vm2, %v620_v42, %v965_v60 }
 0x6eb   : > { %v969_v8 = vpop.permute.xlu1 %968 }
 0x6ec   : > { %v977_v62 = vsel %vm976_vm4, %v975_v61, %v969_v8 }
 0x6f3   : > { %v973_v63 = vpop.permute.xlu0 %972 }
 0x6f4   : > { %v979_v1 = vsel %vm978_vm5, %v977_v62, %v973_v63 }
 0x6f5   : > { %v980_v2 = vpack.c.bf16 %v979_v1, %v979_v1 }
 0x6f7   : > { %1376 = vmatmul.mubr.msk.bf16.vlgmr.msra.gmra.mrb[16].mxu1 %vm415_vm0, %v980_v2 }
 0x6f8   : > { %1743 = shalt.err (!%p1740_p0)
}
 0x6f9   : > { %s1744_s18 = scalar_lea.hbm %s2282_s21, 512  ;;  %s1748_s14 = scalar_lea.hbm %s2371_s8, 1024 }
 0x6fa   : > { %p1745_p10 = scmp.ne.s32.totalorder %s2282_s21, %s1744_s18  ;;  %p1749_p8 = scmp.lt.u32.totalorder %s2282_s21, %s2371_s8 }
 0x6fb   : > { %p1750_p5 = scmp.lt.u32.totalorder %s1748_s14, %s1744_s18  ;;  %p1752_p6 = scmp.lt.u32.totalorder %s1744_s18, %s2282_s21 }
 0x6fc   : > { %p1746_p11 = pnand %p1745_p10, %p2393_p9 }
 0x6fd   : > { %p1751_p7 = por %p1750_p5, %p1749_p8 }
 0x6fe   : > { %p1747_p12 = pneg %p1746_p11 }
 0x6ff   : > { %p1753_p4 = por %p1752_p6, %p1751_p7 }
 0x701   : > { %p1754_p13 = pnand %p1753_p4, %p1747_p12 }
 0x703   : > { %1757 = shalt.err (!%p1754_p13)
}
 0x704   : > { %s1868_s13 = smov 128   ;;  %v1281_v3 = vld [vmem:[#allocation13] ss:$0 sm:$0xff]  ;;  %s1287_s12 = sshll.u32 %s1936_s11, 7 }
 0x705   : > { %1406 = dma.vmem_to_hbm [thread:$0]  (%p2393_p9), %s2284_s10, 512, %s2282_s21, %s1055_s22, %s1868_s13, %s1868_s13, %s1864_s9  }
 0x706   : > { %s403_s18 = scalar_lea.vmem [#allocation14], %s1255_s24  ;;  %s2318_s20 = scalar_lea.hbm %s2370_s7, %s1287_s12 }
 0x707   : > { %s1068_s23 = sshll.u32 %s403_s18, 4  ;;  %s1050_s11 = scalar_lea.sflag [#allocation4], %s2168_s17  ;;  %s2320_s23 = int_to_ptr.vmem [resolvable:$true] %s1068_s23 }
 0x708   : > { %s1758_s24 = scalar_lea.vmem %s2320_s23, 128  ;;  %s1869_s9 = smov [#allocation14]  }
 0x709   : > { %p1759_p1 = scmp.ne.s32.totalorder %s2320_s23, %s1758_s24  ;;  %s1762_s10 = sshll.u32 %s1869_s9, 4  ;;  %s1763_s10 = int_to_ptr.vmem [resolvable:$false] %s1762_s10 }
 0x70a   : > { %s1764_s21 = scalar_lea.vmem %s1763_s10, 256  ;;  %p1765_p0 = scmp.lt.s32.totalorder %s2320_s23, %s1763_s10 }
 0x70b   : > { %p1760_p3 = pnand %p1759_p1, %p2393_p9  ;;  %p1766_p10 = scmp.lt.s32.totalorder %s1764_s21, %s1758_s24 }
 0x70d   : > { %p1761_p2 = pneg %p1760_p3  ;;  %p1767_p11 = por %p1766_p10, %p1765_p0 }
 0x70f   : > { %p1768_p12 = pnand %p1767_p11, %p1761_p2 }
 0x7ca   : > { %v1041_v4 = vpop.f32.mrb[16].mxu1 }
 0x7cb   : > { %v1042_v5 = vadd.f32 %v1281_v3, %v1041_v4  ;;  %v1377_v6 = vpop.f32.mrb[17].mxu1 }
 0x7cc   : > { %v1044_v7 = vpop.f32.mrb[18].mxu1 }
 0x7cd   : > { %v1047_v9 = vadd.f32 %v1042_v5, %v2190_v0  ;;  %v1378_v10 = vpop.f32.mrb[19].mxu1 }
 0x7cf   : > { %1048 = vst.msk [vmem:[%s403_s18] sm:$0xff] %vm415_vm0, %v1047_v9 }
 0x7d0   : > { %1771 = shalt.err (!%p1768_p12)
}
 0x7d1   : > { %s1772_s17 = scalar_lea.hbm %s2318_s20, 128  ;;  %s1776_s13 = scalar_lea.hbm %s2370_s7, 256 }
 0x7d2   : > { %p1773_p8 = scmp.ne.s32.totalorder %s2318_s20, %s1772_s17  ;;  %p1777_p6 = scmp.lt.u32.totalorder %s2318_s20, %s2370_s7 }
 0x7d3   : > { %p1778_p4 = scmp.lt.u32.totalorder %s1776_s13, %s1772_s17  ;;  %p1780_p1 = scmp.lt.u32.totalorder %s1772_s17, %s2318_s20 }
 0x7d4   : > { %p1774_p5 = pnand %p1773_p8, %p2393_p9 }
 0x7d5   : > { %p1779_p13 = por %p1778_p4, %p1777_p6 }
 0x7d6   : > { %p1775_p7 = pneg %p1774_p5 }
 0x7d7   : > { %p1781_p3 = por %p1780_p1, %p1779_p13 }
 0x7d9   : > { %p1782_p2 = pnand %p1781_p3, %p1775_p7 }
 0x7db   : > { %1785 = shalt.err (!%p1782_p2)
}
 0x7dc   : > { %1405 = dma.vmem_to_hbm [thread:$0]  (%p2393_p9), %s2320_s23, 128, %s2318_s20, %s1050_s11  }
 0x7dd PF: > { %s1096_s1 = sand.u32 1, %s1828_s27   ;;  %p2394_p0 = scmp.ne.s32.totalorder %s2384_s19, 0 }
 0x7de   : > { %p2395_p10 = scmp.ge.s32.totalorder %s1840_s30, 2  ;;  %s1097_s14 = scalar_lea.sflag [#allocation4], %s1096_s1 }
 0x7e0   : > { %p1433_p11 = pnand %p2395_p10, %p2394_p0 }
 0x7e2   : > { %1819 = dma.done.wait (!%p1433_p11), %s1097_s14, 128  }
 0x7e3   : > { %1821 = vsyncadd (!%p1433_p11), %s1097_s14, 4294967168  ;;  %s1106_s24 = scalar_lea.sflag [#allocation16], %s1096_s1 }
 0x7e4   : > { %1823 = dma.done.wait (!%p1433_p11), %s1106_s24, 512  }
 0x7e5   : > { %1825 = vsyncadd (!%p1433_p11), %s1106_s24, 4294966784  ;;  %p28_p9 = scmp.ge.s32.totalorder %s2092_s15, 4   ;;  %s2396_s27 = smov %s1832_s28 }
 0x7e6   : > { %s2397_s28 = smov %s1836_s29  ;;  %s2398_s29 = smov %s2103_s26 }
 0x7e7   : > { %s2399_s30 = smov %s2092_s15  ;;  %30 = sbr.rel (!%p28_p9) target bundleno = 12 (0xc), region = 137 }
 0x7ee   :  { %1111 = vsyncpa [#allocation3], 1 }
 0x7ef   :  { %1113 = vsyncpa [#allocation3 + $0x1], 1 }
 0x7f0   :  { %1114 = vsyncpa [#allocation6], 1 }
 0x7f1   :  { %1115 = vsyncpa [#allocation9], 1 }
 0x7f2   :  { %1116 = vsyncpa [#allocation12], 1 }
 0x7f3   :  { %1117 = vsyncpa [#allocation4], 1 }
 0x7f4   :  { %1119 = vsyncpa [#allocation4 + $0x1], 1 }
 0x7f5   :  { %1120 = vsyncpa [#allocation16], 1 }
 0x7f6   :  { %1122 = vsyncpa [#allocation16 + $0x1], 1 }

</bundles_post_ra>
